<compile_context>
chip_gen: v7x
topology: tpu7x:2x2x1
jax: 0.10.0
libtpu: 0.0.40
codegen_flags: <defaults>
</compile_context>

<pallas_src>
import functools

import numpy as np
import jax
import jax.numpy as jnp
from jax.experimental import pallas as pl
from jax.experimental.pallas import tpu as pltpu

POOL_KS = (128, 64, 67)   # FR hard-codes these kernel sizes -> requires H = W = 128
BATCH_BLOCK = 2           # batch elements per grid step -> 256-lane MXU matmuls
NUM_ROW_CHUNKS = 2        # second parallel grid axis (engaged only for 1 batch pair)


def _avg_matrix_np(n, k):
    """(n-k+1, n) banded matrix whose row i averages inputs [i, i+k)."""
    n_out = n - k + 1
    m = np.zeros((n_out, n), dtype=np.float64)
    for i in range(n_out):
        m[i, i:i + k] = 1.0 / k
    return m


@functools.lru_cache(maxsize=None)
def _fr_constants(c, h, w):
    """Host-side (numpy) constants for the fused FR kernel."""
    a = np.concatenate([_avg_matrix_np(h, k) for k in POOL_KS], axis=0)   # (HOUT, H)
    b = np.concatenate([_avg_matrix_np(w, k) for k in POOL_KS], axis=0)   # (WOUT, W)
    hout, wout = a.shape[0], b.shape[0]

    # L' acts on rows ordered (h*C + c) and emits rows ordered (h'*C + c):
    #   L'[h'*C + c, h*C + c] = A[h', h]
    # i.e. the torch.transpose(1, 2) interleave is already baked into the row order.
    lp = np.zeros((c * hout, c * h), dtype=np.float64)
    for ci in range(c):
        lp[ci::c, ci::c] = a

    bt = b.T                                                              # (W, WOUT)
    return (jnp.asarray(lp, jnp.float32), jnp.asarray(bt, jnp.float32), hout, wout)


def _fr_kernel(x_ref, l_ref, bt_ref, out_ref):
    # x_ref:   (1, H*C, 2W)     one PAIR of batch elements, rows ordered (h*C + c),
    #                           lanes = [elem-a's W columns | elem-b's W columns]
    # l_ref:   (RC, H*C)        this grid step's row chunk of L'
    # bt_ref:  (W, WOUT)        stacked W-direction averaging matrices, transposed
    # out_ref: (2, RC, W+WOUT)  rows ordered (h'*C + c) == folded torch.transpose(1,2)
    chunk = l_ref.shape[0]
    w = x_ref.shape[2] // 2

    xr = x_ref[0]                                                         # (H*C, 2W)

    # All three H-direction pools, all channels, BOTH batch elements: one 256-lane
    # MXU matmul (no permutation matmul needed anymore).
    ph2 = jnp.dot(l_ref[...], xr, preferred_element_type=jnp.float32)     # (RC, 2W)

    # W-direction pools need only this step's output-row chunk of x.
    row0 = pl.multiple_of(pl.program_id(1) * chunk, 8)
    xr_r = x_ref[0, pl.ds(row0, chunk), :]                                # (RC, 2W)
    pw_a = jnp.dot(xr_r[:, :w], bt_ref[...], preferred_element_type=jnp.float32)
    pw_b = jnp.dot(xr_r[:, w:], bt_ref[...], preferred_element_type=jnp.float32)

    # Four lane-aligned, unmasked 128-wide stores (no in-kernel concatenate).
    out_ref[0, :, :w] = ph2[:, :w].astype(out_ref.dtype)
    out_ref[1, :, :w] = ph2[:, w:].astype(out_ref.dtype)
    out_ref[0, :, w:] = pw_a.astype(out_ref.dtype)
    out_ref[1, :, w:] = pw_b.astype(out_ref.dtype)


def fr_forward(x):
    """x: (N, C, 128, 128) f32 -> (N, 128, C, 256), matching FR.forward (PyTorch)."""
    n, c, h, w = x.shape
    assert (h, w) == (128, 128), "FR's pooling sizes (128, 64, 67) force 128x128 inputs"
    lp, bt, hout, wout = _fr_constants(c, h, w)
    out_w = w + wout

    # Pad batch to a multiple of BATCH_BLOCK (2 elements per grid step).
    n_pad = ((n + BATCH_BLOCK - 1) // BATCH_BLOCK) * BATCH_BLOCK
    if n_pad != n:
        x = jnp.concatenate([x, jnp.zeros((n_pad - n, c, h, w), x.dtype)], axis=0)
    pairs = n_pad // BATCH_BLOCK

    # Fold the module's transpose(1, 2) into the input row order ((h, c) rows) and put
    # the 2 batch elements of each pair side-by-side along lanes. Last dim preserved,
    # so XLA emits a cheap tiled copy, not a full transpose pass.
    x_rows = jnp.transpose(x.reshape(pairs, BATCH_BLOCK, c, h, w),
                           (0, 3, 2, 1, 4)).reshape(pairs, h * c, BATCH_BLOCK * w)

    # Split output rows across a second parallel axis only when the pair axis alone
    # can't feed both v7x TensorCores; for pairs >= 2 keep L' in one grid-invariant
    # block so it is fetched once (no redundant HBM traffic on mem-bound v5e/v6e).
    num_row_chunks = NUM_ROW_CHUNKS if pairs == 1 else 1
    chunk = (c * hout) // num_row_chunks          # 64*c (or 128*c), multiple of 8

    out = pl.pallas_call(
        _fr_kernel,
        out_shape=jax.ShapeDtypeStruct((n_pad, c * hout, out_w), jnp.float32),
        grid_spec=pltpu.PrefetchScalarGridSpec(
            num_scalar_prefetch=0,
            grid=(pairs, num_row_chunks),
            in_specs=[
                pl.BlockSpec((1, h * c, BATCH_BLOCK * w), lambda p, r: (p, 0, 0)),
                pl.BlockSpec((chunk, c * h), lambda p, r: (r, 0)),
                pl.BlockSpec((w, wout), lambda p, r: (0, 0)),
            ],
            out_specs=pl.BlockSpec((BATCH_BLOCK, chunk, out_w),
                                   lambda p, r: (p, r, 0)),
        ),
        compiler_params=pltpu.CompilerParams(
            dimension_semantics=("parallel", "parallel")),
    )(x_rows, lp, bt)

    # Kernel rows are already (h', c)-interleaved, so the module's
    # torch.transpose(1, 2) is just a FREE dim-split reshape here.
    return out[:n].reshape(n, hout, c, out_w)


# TODO(synk): Sy_Attention_Model's downstream ops (feature0 @ feature0^T matmuls,
# residual add, Conv2d(1024, 1024, (1, 7), stride (1, 2))) are not implemented here;
# they require C == 1024 inputs and are out of scope for this FR kernel.  For that C,
# the dense L' constant would be O(C^2) — use per-channel tiling over a channel grid
# axis instead of this dense-constant formulation.


# ---------------- independent numpy float64 reference ----------------
def fr_reference_np(x):
    x64 = np.asarray(x, dtype=np.float64)

    def pool_axis(a, k, axis):
        nwin = a.shape[axis] - k + 1
        outs = []
        for i in range(nwin):
            sl = [slice(None)] * a.ndim
            sl[axis] = slice(i, i + k)
            outs.append(a[tuple(sl)].mean(axis=axis, keepdims=True))
        return np.concatenate(outs, axis=axis)

    ph = np.concatenate([pool_axis(x64, k, 2) for k in POOL_KS], axis=2)  # (N,C,128,W)
    pw = np.concatenate([pool_axis(x64, k, 3) for k in POOL_KS], axis=3)  # (N,C,H,128)
    pooling = np.concatenate([ph, pw], axis=3)                            # (N,C,128,256)
    return np.transpose(pooling, (0, 2, 1, 3))                            # (N,128,C,256)


if __name__ == "__main__":
    key = jax.random.PRNGKey(0)
    N, C = 2, 3
    x = jax.random.normal(key, (N, C, 128, 128), dtype=jnp.float32)

    fr = jax.jit(fr_forward)
    out = jax.block_until_ready(fr(x))

    assert out.shape == (N, 128, C, 256), out.shape
    ref = fr_reference_np(np.asarray(x))
    np.testing.assert_allclose(np.asarray(out), ref.astype(np.float32),
                               rtol=1e-4, atol=1e-4)
    print("KERNEL_OK")
</pallas_src>

<mosaic_0001>
module attributes {stable_mosaic.version = 11 : i64} {
  func.func @_fr_kernel(%arg0: i32, %arg1: i32, %arg2: memref<1x384x256xf32, #tpu.memory_space<vmem>>, %arg3: memref<192x384xf32, #tpu.memory_space<vmem>>, %arg4: memref<128x128xf32, #tpu.memory_space<vmem>>, %arg5: memref<2x192x256xf32, #tpu.memory_space<vmem>>) attributes {dimension_semantics = [#tpu.dimension_semantics<parallel>, #tpu.dimension_semantics<parallel>], iteration_bounds = array<i64: 1, 2>, scalar_prefetch = 0 : i64, scratch_operands = 0 : i64, tpu.core_type = #tpu.core_type<tc>, window_params = [{transform_indices = @transform_0, window_bounds = array<i64: 1, 384, 256>}, {transform_indices = @transform_1, window_bounds = array<i64: 192, 384>}, {pipeline_mode = #tpu.pipeline_mode<synchronous>, transform_indices = @transform_2, window_bounds = array<i64: 128, 128>}, {transform_indices = @transform_3, window_bounds = array<i64: 2, 192, 256>}]} {
    %c0 = arith.constant 0 : index
    %c0_0 = arith.constant 0 : index
    %c0_1 = arith.constant 0 : index
    %0 = vector.load %arg2[%c0, %c0_0, %c0_1] : memref<1x384x256xf32, #tpu.memory_space<vmem>>, vector<1x384x256xf32>
    %1 = vector.shape_cast %0 : vector<1x384x256xf32> to vector<384x256xf32>
    %c0_2 = arith.constant 0 : index
    %c0_3 = arith.constant 0 : index
    %2 = vector.load %arg3[%c0_2, %c0_3] : memref<192x384xf32, #tpu.memory_space<vmem>>, vector<192x384xf32>
    %cst = arith.constant dense<0.000000e+00> : vector<192x256xf32>
    %3 = tpu.matmul %2, %1, %cst {dimension_numbers = #tpu.dot_dimension_numbers<[1], [0], [0], [1], [0, 0, 1, 1], [], []>} : vector<192x384xf32>, vector<384x256xf32>, vector<192x256xf32> -> vector<192x256xf32>
    %c192_i32 = arith.constant 192 : i32
    %4 = arith.muli %arg1, %c192_i32 : i32
    %5 = tpu.assume_multiple %4, 8 : i32
    %c0_4 = arith.constant 0 : index
    %6 = arith.index_cast %5 : i32 to index
    %c0_5 = arith.constant 0 : index
    %7 = vector.load %arg2[%c0_4, %6, %c0_5] : memref<1x384x256xf32, #tpu.memory_space<vmem>>, vector<1x192x256xf32>
    %8 = vector.shape_cast %7 : vector<1x192x256xf32> to vector<192x256xf32>
    %9 = vector.extract_strided_slice %8 {offsets = [0, 0], sizes = [192, 128], strides = [1, 1]} : vector<192x256xf32> to vector<192x128xf32>
    %c0_6 = arith.constant 0 : index
    %c0_7 = arith.constant 0 : index
    %10 = vector.load %arg4[%c0_6, %c0_7] : memref<128x128xf32, #tpu.memory_space<vmem>>, vector<128x128xf32>
    %cst_8 = arith.constant dense<0.000000e+00> : vector<192x128xf32>
    %11 = tpu.matmul %9, %10, %cst_8 {dimension_numbers = #tpu.dot_dimension_numbers<[1], [0], [0], [1], [0, 0, 1, 1], [], []>} : vector<192x128xf32>, vector<128x128xf32>, vector<192x128xf32> -> vector<192x128xf32>
    %12 = vector.extract_strided_slice %8 {offsets = [0, 128], sizes = [192, 128], strides = [1, 1]} : vector<192x256xf32> to vector<192x128xf32>
    %c0_9 = arith.constant 0 : index
    %c0_10 = arith.constant 0 : index
    %13 = vector.load %arg4[%c0_9, %c0_10] : memref<128x128xf32, #tpu.memory_space<vmem>>, vector<128x128xf32>
    %cst_11 = arith.constant dense<0.000000e+00> : vector<192x128xf32>
    %14 = tpu.matmul %12, %13, %cst_11 {dimension_numbers = #tpu.dot_dimension_numbers<[1], [0], [0], [1], [0, 0, 1, 1], [], []>} : vector<192x128xf32>, vector<128x128xf32>, vector<192x128xf32> -> vector<192x128xf32>
    %15 = vector.extract_strided_slice %3 {offsets = [0, 0], sizes = [192, 128], strides = [1, 1]} : vector<192x256xf32> to vector<192x128xf32>
    %c0_12 = arith.constant 0 : index
    %c0_13 = arith.constant 0 : index
    %c0_14 = arith.constant 0 : index
    %16 = vector.load %arg5[%c0_12, %c0_13, %c0_14] : memref<2x192x256xf32, #tpu.memory_space<vmem>>, vector<1x192x128xf32>
    %17 = vector.shape_cast %16 : vector<1x192x128xf32> to vector<192x128xf32>
    %18 = vector.shape_cast %15 : vector<192x128xf32> to vector<1x192x128xf32>
    tpu.vector_store %arg5[%c0_12, %c0_13, %c0_14], %18 {strides = array<i32>} : memref<2x192x256xf32, #tpu.memory_space<vmem>>, vector<1x192x128xf32>,
    %19 = vector.extract_strided_slice %3 {offsets = [0, 128], sizes = [192, 128], strides = [1, 1]} : vector<192x256xf32> to vector<192x128xf32>
    %c1 = arith.constant 1 : index
    %c0_15 = arith.constant 0 : index
    %c0_16 = arith.constant 0 : index
    %20 = vector.load %arg5[%c1, %c0_15, %c0_16] : memref<2x192x256xf32, #tpu.memory_space<vmem>>, vector<1x192x128xf32>
    %21 = vector.shape_cast %20 : vector<1x192x128xf32> to vector<192x128xf32>
    %22 = vector.shape_cast %19 : vector<192x128xf32> to vector<1x192x128xf32>
    tpu.vector_store %arg5[%c1, %c0_15, %c0_16], %22 {strides = array<i32>} : memref<2x192x256xf32, #tpu.memory_space<vmem>>, vector<1x192x128xf32>,
    %c0_17 = arith.constant 0 : index
    %c0_18 = arith.constant 0 : index
    %c128 = arith.constant 128 : index
    %23 = vector.load %arg5[%c0_17, %c0_18, %c128] : memref<2x192x256xf32, #tpu.memory_space<vmem>>, vector<1x192x128xf32>
    %24 = vector.shape_cast %23 : vector<1x192x128xf32> to vector<192x128xf32>
    %25 = vector.shape_cast %11 : vector<192x128xf32> to vector<1x192x128xf32>
    tpu.vector_store %arg5[%c0_17, %c0_18, %c128], %25 {strides = array<i32>} : memref<2x192x256xf32, #tpu.memory_space<vmem>>, vector<1x192x128xf32>,
    %c1_19 = arith.constant 1 : index
    %c0_20 = arith.constant 0 : index
    %c128_21 = arith.constant 128 : index
    %26 = vector.load %arg5[%c1_19, %c0_20, %c128_21] : memref<2x192x256xf32, #tpu.memory_space<vmem>>, vector<1x192x128xf32>
    %27 = vector.shape_cast %26 : vector<1x192x128xf32> to vector<192x128xf32>
    %28 = vector.shape_cast %14 : vector<192x128xf32> to vector<1x192x128xf32>
    tpu.vector_store %arg5[%c1_19, %c0_20, %c128_21], %28 {strides = array<i32>} : memref<2x192x256xf32, #tpu.memory_space<vmem>>, vector<1x192x128xf32>,
    return
  }
  func.func @transform_0(%arg0: i32, %arg1: i32) -> (i32, i32, i32) {
    %c0_i32 = arith.constant 0 : i32
    %c0_i32_0 = arith.constant 0 : i32
    %c0_i32_1 = arith.constant 0 : i32
    return %arg0, %c0_i32, %c0_i32_0 : i32, i32, i32
  }
  func.func @transform_1(%arg0: i32, %arg1: i32) -> (i32, i32) {
    %c0_i32 = arith.constant 0 : i32
    %c0_i32_0 = arith.constant 0 : i32
    return %arg1, %c0_i32 : i32, i32
  }
  func.func @transform_2(%arg0: i32, %arg1: i32) -> (i32, i32) {
    %c0_i32 = arith.constant 0 : i32
    %c0_i32_0 = arith.constant 0 : i32
    %c0_i32_1 = arith.constant 0 : i32
    return %c0_i32, %c0_i32_0 : i32, i32
  }
  func.func @transform_3(%arg0: i32, %arg1: i32) -> (i32, i32, i32) {
    %c0_i32 = arith.constant 0 : i32
    %c0_i32_0 = arith.constant 0 : i32
    return %arg0, %arg1, %c0_i32 : i32, i32, i32
  }
}

</mosaic_0001>

<bundles_post_ra>
// kernel: fr_forward.1
= control target key start
LH: loop header
LB: loop body
LE: loop exit
PB: predicated region body
PF: predicated region fallthrough
CT: control target
= control target key end

     0   :  { %s2238_s12 = smov 0   ;;  %s2240_s13 = smov 0   ;;  %s3287_s0 = inlined_call_operand.vmem [shape: f32[1,384,256], index: 0, kind: input, shape index: {}]   ;;  %s3288_s1 = inlined_call_operand.vmem [shape: f32[384,384], index: 1, kind: input, shape index: {}]   ;;  %s3289_s2 = inlined_call_operand.vmem [shape: f32[128,128], index: 2, kind: input, shape index: {}]   ;;  %s3290_s3 = inlined_call_operand.vmem [shape: f32[2,384,256], index: 3, kind: output, shape index: {}]  }
   0x1   :  { %s2242_s14 = smov 0   ;;  %s2244_s15 = smov 0  }
   0x2   :  { %s2246_s16 = smov 0  }
   0x3 LB: > { %s1629_s17 = sadd.s32 4294967295, %s2215_s16   ;;  %s22_s18 = sadd.s32 1, %s2211_s15  ;;  %s2215_s16 = sphi %s2246_s16, %s13_s16   ;;  %s2211_s15 = sphi %s2244_s15, %s3296_s15   ;;  %s2207_s14 = sphi %s2242_s14, %s3295_s14   ;;  %s2203_s13 = sphi %s2240_s13, %s3294_s13   ;;  %s2199_s12 = sphi %s2238_s12, %s3293_s12  }
   0x4   : > { %p23_p0 = scmp.ge.s32.totalorder %s22_s18, 2  ;;  %s107_s19 = sadd.s32 1, %s2203_s13 }
   0x5   : > { %p117_p1 = scmp.ne.s32.totalorder %s2203_s13, %s2199_s12  ;;  %p118_p2 = scmp.eq.s32.totalorder %s1629_s17, 1 }
   0x6   : > { %s3298_s18 = smov (%p23_p0, %s22_s18), 0  ;;  %p1634_p4 = scmp.ge.s32.totalorder %s2215_s16, 1 }
   0x7   : > { %p2270_p3 = por %p118_p2, %p117_p1  ;;  %s103_s21 = ssub.s32 %s2211_s15, %s3298_s18 }
   0x8   : > { %p163_p5 = scmp.lt.s32.totalorder %s2215_s16, 3  ;;  %p105_p6 = scmp.eq.s32.totalorder %s103_s21, 0 }
   0xa   : > { %p164_p7 = pnand %p1634_p4, %p163_p5 }
   0xb   : > { %s2279_s22 = scalar_select %p105_p6, %s2203_s13, %s107_s19  }
   0xc   : > { %167 = sbr.rel (%p164_p7) target bundleno = 443 (0x1bb), region = 32  ;;  %v207_v0 = vld [vmem:[%s3287_s0 + $0x8] sm:$0xff] (!%p164_p7)  ;;  %v209_v1 = vld [vmem:[%s3287_s0 + $0x18] sm:$0xff] (!%p164_p7)  ;;  %v206_v5 = vld [vmem:[%s3287_s0] sm:$0xff] (!%p164_p7)  ;;  %v2217_v7 = vmov (!%p164_p7), 0.0  }
   0xd   : > { %v271_v2 = vld [vmem:[%s3287_s0 + $0x208] sm:$0xff] (!%p164_p7)  ;;  %v1910_v3 = vpack.c.bf16 (!%p164_p7), %v209_v1, %v207_v0  ;;  %v273_v4 = vld [vmem:[%s3287_s0 + $0x218] sm:$0xff] (!%p164_p7)  ;;  %v208_v6 = vld [vmem:[%s3287_s0 + $0x10] sm:$0xff] (!%p164_p7)  ;;  %695 = vmatprep.mubr.f32.mxu1 (!%p164_p7), %v2217_v7  ;;  %s197_s4 = smul.u32 (!%p164_p7), 24, %s2207_s14 }
   0xe   : > { %v2300_v8 = vpack.c.bf16 (!%p164_p7), %v273_v4, %v271_v2  ;;  %v1912_v9 = vpack.c.bf16 (!%p164_p7), %v208_v6, %v206_v5  ;;  %v270_v10 = vld [vmem:[%s3287_s0 + $0x200] sm:$0xff] (!%p164_p7)  ;;  %v272_v11 = vld [vmem:[%s3287_s0 + $0x210] sm:$0xff] (!%p164_p7)  ;;  %v211_v12 = vld [vmem:[%s3287_s0 + $0x28] sm:$0xff] (!%p164_p7)  ;;  %s792_s6 = smul.u32 (!%p164_p7), 192, %s2207_s14 }
   0xf   : > { %1911 = vmatprep.subr.bf16.mxu0 (!%p164_p7), %v1910_v3  ;;  %v2311_v13 = vpack.c.bf16 (!%p164_p7), %v272_v11, %v270_v10  ;;  %v213_v14 = vld [vmem:[%s3287_s0 + $0x38] sm:$0xff] (!%p164_p7)  ;;  %v275_v15 = vld [vmem:[%s3287_s0 + $0x228] sm:$0xff] (!%p164_p7)  ;;  %v210_v19 = vld [vmem:[%s3287_s0 + $0x20] sm:$0xff] (!%p164_p7)  ;;  %p2466_p8 = scmp.lt.s32.totalorder (!%p164_p7), %s197_s4, 47 }
  0x10   : > { %v277_v16 = vld [vmem:[%s3287_s0 + $0x238] sm:$0xff] (!%p164_p7)  ;;  %2070 = vmatprep.subr.bf16.mxu1 (!%p164_p7), %v2300_v8  ;;  %1913 = vmatpush1.bf16.msra.mxu0 (!%p164_p7), %v1912_v9  ;;  %v1914_v17 = vpack.c.bf16 (!%p164_p7), %v213_v14, %v211_v12  ;;  %v212_v20 = vld [vmem:[%s3287_s0 + $0x30] sm:$0xff] (!%p164_p7)  ;;  %v274_v21 = vld [vmem:[%s3287_s0 + $0x220] sm:$0xff] (!%p164_p7)  ;;  %s793_s29 = sshra.s32 (!%p164_p7), %s792_s6, 3 }
  0x11   : > { %v2323_v18 = vpack.c.bf16 (!%p164_p7), %v277_v16, %v275_v15  ;;  %2078 = vmatpush1.bf16.msra.mxu1 (!%p164_p7), %v2311_v13  ;;  %v1916_v22 = vpack.c.bf16 (!%p164_p7), %v212_v20, %v210_v19  ;;  %v276_v23 = vld [vmem:[%s3287_s0 + $0x230] sm:$0xff] (!%p164_p7)  ;;  %v215_v24 = vld [vmem:[%s3287_s0 + $0x48] sm:$0xff] (!%p164_p7)  ;;  %v217_v25 = vld [vmem:[%s3287_s0 + $0x58] sm:$0xff] (!%p164_p7) }
  0x12   : > { %1915 = vmatprep.subr.bf16.mxu0 (!%p164_p7), %v1914_v17  ;;  %v2345_v26 = vpack.c.bf16 (!%p164_p7), %v276_v23, %v274_v21  ;;  %v1918_v27 = vpack.c.bf16 (!%p164_p7), %v217_v25, %v215_v24  ;;  %v279_v28 = vld [vmem:[%s3287_s0 + $0x248] sm:$0xff] (!%p164_p7)  ;;  %v281_v29 = vld [vmem:[%s3287_s0 + $0x258] sm:$0xff] (!%p164_p7)  ;;  %v214_v30 = vld [vmem:[%s3287_s0 + $0x40] sm:$0xff] (!%p164_p7) }
  0x13   : > { %2071 = vmatprep.subr.bf16.mxu1 %v2323_v18  ;;  %v2356_v31 = vpack.c.bf16 %v281_v29, %v279_v28  ;;  %v216_v32 = vld [vmem:[%s3287_s0 + $0x50] sm:$0xff]  ;;  %v278_v33 = vld [vmem:[%s3287_s0 + $0x240] sm:$0xff]  ;;  %v219_v36 = vld [vmem:[%s3287_s0 + $0x68] sm:$0xff]  ;;  %s3300_s4 = smov (!%p2466_p8, %s197_s4), 47 }
  0x14   : > { %v280_v34 = vld [vmem:[%s3287_s0 + $0x250] sm:$0xff]  ;;  %1917 = vmatpush1.bf16.msra.mxu0 %v1916_v22  ;;  %v1920_v35 = vpack.c.bf16 %v216_v32, %v214_v30  ;;  %v221_v37 = vld [vmem:[%s3287_s0 + $0x78] sm:$0xff]  ;;  %v283_v38 = vld [vmem:[%s3287_s0 + $0x268] sm:$0xff]  ;;  %s2135_s26 = smul.u32 24, %s3300_s4  ;;  %s1690_s4 = sshll.u32 %s793_s29, 4 }
  0x15   : > { %2079 = vmatpush1.bf16.msra.mxu1 %v2345_v26  ;;  %1919 = vmatprep.subr.bf16.mxu0 %v1918_v27  ;;  %v2377_v39 = vpack.c.bf16 %v280_v34, %v278_v33  ;;  %v1922_v40 = vpack.c.bf16 %v221_v37, %v219_v36  ;;  %v285_v41 = vld [vmem:[%s3287_s0 + $0x278] sm:$0xff]  ;;  %v218_v42 = vld [vmem:[%s3287_s0 + $0x60] sm:$0xff]  ;;  %v220_v43 = vld [vmem:[%s3287_s0 + $0x70] sm:$0xff]  ;;  %s2779_s9 = scalar_lea.vmem %s3287_s0, %s1690_s4 }
  0x16   : > { %2072 = vmatprep.subr.bf16.mxu1 %v2356_v31  ;;  %v2389_v44 = vpack.c.bf16 %v285_v41, %v283_v38  ;;  %v282_v45 = vld [vmem:[%s3287_s0 + $0x260] sm:$0xff]  ;;  %v284_v46 = vld [vmem:[%s3287_s0 + $0x270] sm:$0xff]  ;;  %v223_v47 = vld [vmem:[%s3287_s0 + $0x88] sm:$0xff]  ;;  %v1924_v51 = vpack.c.bf16 %v220_v43, %v218_v42  ;;  %s2556_s10 = scalar_lea.vmem %s3288_s1, %s2135_s26 }
  0x17   : > { %v225_v48 = vld [vmem:[%s3287_s0 + $0x98] sm:$0xff]  ;;  %v287_v49 = vld [vmem:[%s3287_s0 + $0x288] sm:$0xff]  ;;  %v2410_v52 = vpack.c.bf16 %v284_v46, %v282_v45  ;;  %v222_v54 = vld [vmem:[%s3287_s0 + $0x80] sm:$0xff] }
  0x18   : > { %v289_v50 = vld [vmem:[%s3287_s0 + $0x298] sm:$0xff]  ;;  %1921 = vmatpush1.bf16.msra.mxu0 %v1920_v35  ;;  %v1926_v53 = vpack.c.bf16 %v225_v48, %v223_v47  ;;  %v224_v55 = vld [vmem:[%s3287_s0 + $0x90] sm:$0xff]  ;;  %v286_v56 = vld [vmem:[%s3287_s0 + $0x280] sm:$0xff] }
  0x19   : > { %2080 = vmatpush1.bf16.msra.mxu1 %v2377_v39  ;;  %1923 = vmatprep.subr.bf16.mxu0 %v1922_v40  ;;  %v2422_v57 = vpack.c.bf16 %v289_v50, %v287_v49  ;;  %v288_v58 = vld [vmem:[%s3287_s0 + $0x290] sm:$0xff]  ;;  %v227_v59 = vld [vmem:[%s3287_s0 + $0xa8] sm:$0xff]  ;;  %v229_v60 = vld [vmem:[%s3287_s0 + $0xb8] sm:$0xff]  ;;  %v1928_v63 = vpack.c.bf16 %v224_v55, %v222_v54 }
  0x1a   : > { %2073 = vmatprep.subr.bf16.mxu1 %v2389_v44  ;;  %v291_v61 = vld [vmem:[%s3287_s0 + $0x2a8] sm:$0xff]  ;;  %v293_v62 = vld [vmem:[%s3287_s0 + $0x2b8] sm:$0xff]  ;;  %v2441_v0 = vpack.c.bf16 %v288_v58, %v286_v56  ;;  %v1930_v1 = vpack.c.bf16 %v229_v60, %v227_v59  ;;  %v226_v2 = vld [vmem:[%s3287_s0 + $0xa0] sm:$0xff] }
  0x1b   : > { %v228_v3 = vld [vmem:[%s3287_s0 + $0xb0] sm:$0xff]  ;;  %v290_v4 = vld [vmem:[%s3287_s0 + $0x2a0] sm:$0xff]  ;;  %v2453_v5 = vpack.c.bf16 %v293_v62, %v291_v61  ;;  %v231_v9 = vld [vmem:[%s3287_s0 + $0xc8] sm:$0xff] }
  0x1c   : > { %1925 = vmatpush1.bf16.msra.mxu0 %v1924_v51  ;;  %v292_v6 = vld [vmem:[%s3287_s0 + $0x2b0] sm:$0xff]  ;;  %v233_v10 = vld [vmem:[%s3287_s0 + $0xd8] sm:$0xff]  ;;  %v295_v11 = vld [vmem:[%s3287_s0 + $0x2c8] sm:$0xff]  ;;  %v1932_v14 = vpack.c.bf16 %v228_v3, %v226_v2 }
  0x1d   : > { %2081 = vmatpush1.bf16.msra.mxu1 %v2410_v52  ;;  %1927 = vmatprep.subr.bf16.mxu0 %v1926_v53  ;;  %v297_v12 = vld [vmem:[%s3287_s0 + $0x2d8] sm:$0xff]  ;;  %v2477_v15 = vpack.c.bf16 %v292_v6, %v290_v4  ;;  %v1934_v16 = vpack.c.bf16 %v233_v10, %v231_v9  ;;  %v230_v17 = vld [vmem:[%s3287_s0 + $0xc0] sm:$0xff]  ;;  %v232_v19 = vld [vmem:[%s3287_s0 + $0xd0] sm:$0xff] }
  0x1e   : > { %2074 = vmatprep.subr.bf16.mxu1 %v2422_v57  ;;  %v294_v20 = vld [vmem:[%s3287_s0 + $0x2c0] sm:$0xff]  ;;  %v2489_v21 = vpack.c.bf16 %v297_v12, %v295_v11  ;;  %v296_v22 = vld [vmem:[%s3287_s0 + $0x2d0] sm:$0xff]  ;;  %v235_v23 = vld [vmem:[%s3287_s0 + $0xe8] sm:$0xff]  ;;  %v1936_v28 = vpack.c.bf16 %v232_v19, %v230_v17 }
  0x1f   : > { %v237_v24 = vld [vmem:[%s3287_s0 + $0xf8] sm:$0xff]  ;;  %v299_v25 = vld [vmem:[%s3287_s0 + $0x2e8] sm:$0xff]  ;;  %v2513_v29 = vpack.c.bf16 %v296_v22, %v294_v20  ;;  %v234_v32 = vld [vmem:[%s3287_s0 + $0xe0] sm:$0xff] }
  0x20   : > { %1929 = vmatpush1.bf16.msra.mxu0 %v1928_v63  ;;  %v301_v27 = vld [vmem:[%s3287_s0 + $0x2f8] sm:$0xff]  ;;  %v1938_v30 = vpack.c.bf16 %v237_v24, %v235_v23  ;;  %v236_v33 = vld [vmem:[%s3287_s0 + $0xf0] sm:$0xff]  ;;  %v298_v34 = vld [vmem:[%s3287_s0 + $0x2e0] sm:$0xff] }
  0x21   : > { %2082 = vmatpush1.bf16.msra.mxu1 %v2441_v0  ;;  %1931 = vmatprep.subr.bf16.mxu0 %v1930_v1  ;;  %v2525_v35 = vpack.c.bf16 %v301_v27, %v299_v25  ;;  %v300_v36 = vld [vmem:[%s3287_s0 + $0x2f0] sm:$0xff]  ;;  %v239_v37 = vld [vmem:[%s3287_s0 + $0x108] sm:$0xff]  ;;  %v241_v38 = vld [vmem:[%s3287_s0 + $0x118] sm:$0xff]  ;;  %v1940_v42 = vpack.c.bf16 %v236_v33, %v234_v32 }
  0x22   : > { %2075 = vmatprep.subr.bf16.mxu1 %v2453_v5  ;;  %v846_v40 = vld [vmem:[%s3289_s2] sm:$0xff]  ;;  %v847_v41 = vld [vmem:[%s3289_s2 + $0x8] sm:$0xff]  ;;  %v2544_v43 = vpack.c.bf16 %v300_v36, %v298_v34  ;;  %v1942_v45 = vpack.c.bf16 %v241_v38, %v239_v37  ;;  %v240_v47 = vld [vmem:[%s3287_s0 + $0x110] sm:$0xff] }
  0x23   : > { %v238_v46 = vld [vmem:[%s3287_s0 + $0x100] sm:$0xff]  ;;  %v2558_v48 = vpack.c.bf16 %v847_v41, %v846_v40  ;;  %v243_v49 = vld [vmem:[%s3287_s0 + $0x128] sm:$0xff]  ;;  %v245_v50 = vld [vmem:[%s3287_s0 + $0x138] sm:$0xff] }
  0x24   : > { %1933 = vmatpush1.bf16.msra.mxu0 %v1932_v14  ;;  %v848_v51 = vld [vmem:[%s3289_s2 + $0x10] sm:$0xff]  ;;  %v849_v53 = vld [vmem:[%s3289_s2 + $0x18] sm:$0xff]  ;;  %v1944_v54 = vpack.c.bf16 %v240_v47, %v238_v46  ;;  %v242_v56 = vld [vmem:[%s3287_s0 + $0x120] sm:$0xff]  ;;  %v1946_v59 = vpack.c.bf16 %v245_v50, %v243_v49 }
  0x25   : > { %2083 = vmatpush1.bf16.msra.mxu1 %v2477_v15  ;;  %1935 = vmatprep.subr.bf16.mxu0 %v1934_v16  ;;  %v328_v55 = vld [vmem:[%s2556_s10 + $0xd0] sm:$0xff]  ;;  %v247_v60 = vld [vmem:[%s3287_s0 + $0x148] sm:$0xff]  ;;  %v249_v61 = vld [vmem:[%s3287_s0 + $0x158] sm:$0xff]  ;;  %v2587_v62 = vpack.c.bf16 %v849_v53, %v848_v51 }
  0x26   : > { %2076 = vmatprep.subr.bf16.mxu1 %v2489_v21  ;;  %v244_v58 = vld [vmem:[%s3287_s0 + $0x130] sm:$0xff]  ;;  %v331_v63 = vld [vmem:[%s2556_s10 + $0xe8] sm:$0xff]  ;;  %v850_v2 = vld [vmem:[%s3289_s2 + $0x20] sm:$0xff]  ;;  %v1950_v4 = vpack.c.bf16 %v249_v61, %v247_v60 }
  0x27   : > { %v1948_v1 = vpack.c.bf16 %v244_v58, %v242_v56  ;;  %v851_v3 = vld [vmem:[%s3289_s2 + $0x28] sm:$0xff]  ;;  %v246_v6 = vld [vmem:[%s3287_s0 + $0x140] sm:$0xff]  ;;  %v248_v9 = vld [vmem:[%s3287_s0 + $0x150] sm:$0xff] }
  0x28   : > { %1937 = vmatpush1.bf16.msra.mxu0 %v1936_v28  ;;  %v303_v10 = vld [vmem:[%s2556_s10 + $0x8] sm:$0xff]  ;;  %v253_v12 = vld [vmem:[%s3287_s0 + $0x178] sm:$0xff]  ;;  %v2612_v14 = vpack.c.bf16 %v851_v3, %v850_v2  ;;  %v1952_v16 = vpack.c.bf16 %v248_v9, %v246_v6  ;;  %v852_v17 = vld [vmem:[%s3289_s2 + $0x30] sm:$0xff] }
  0x29   : > { %2084 = vmatpush1.bf16.msra.mxu1 %v2513_v29  ;;  %1939 = vmatprep.subr.bf16.mxu0 %v1938_v30  ;;  %v251_v11 = vld [vmem:[%s3287_s0 + $0x168] sm:$0xff]  ;;  %v853_v19 = vld [vmem:[%s3289_s2 + $0x38] sm:$0xff]  ;;  %v334_v20 = vld [vmem:[%s2556_s10 + $0x100] sm:$0xff] }
  0x2a   : > { %2077 = vmatprep.subr.bf16.mxu1 %v2525_v35  ;;  %438 = vmatprep.mubr.f32.mxu0 %v303_v10  ;;  %v1954_v22 = vpack.c.bf16 %v253_v12, %v251_v11  ;;  %v250_v23 = vld [vmem:[%s3287_s0 + $0x160] sm:$0xff]  ;;  %v252_v24 = vld [vmem:[%s3287_s0 + $0x170] sm:$0xff]  ;;  %v255_v25 = vld [vmem:[%s3287_s0 + $0x188] sm:$0xff]  ;;  %v2636_v28 = vpack.c.bf16 %v853_v19, %v852_v17 }
  0x2b   : > { %v257_v27 = vld [vmem:[%s3287_s0 + $0x198] sm:$0xff]  ;;  %v1956_v30 = vpack.c.bf16 %v252_v24, %v250_v23  ;;  %v854_v32 = vld [vmem:[%s3289_s2 + $0x40] sm:$0xff]  ;;  %v855_v33 = vld [vmem:[%s3289_s2 + $0x48] sm:$0xff] }
  0x2c   : > { %1941 = vmatpush1.bf16.msra.mxu0 %v1940_v42  ;;  %v337_v34 = vld [vmem:[%s2556_s10 + $0x118] sm:$0xff]  ;;  %v1958_v36 = vpack.c.bf16 %v257_v27, %v255_v25  ;;  %v254_v37 = vld [vmem:[%s3287_s0 + $0x180] sm:$0xff]  ;;  %v256_v38 = vld [vmem:[%s3287_s0 + $0x190] sm:$0xff]  ;;  %v2660_v42 = vpack.c.bf16 %v855_v33, %v854_v32 }
  0x2d   : > { %2085 = vmatpush1.bf16.msra.mxu1 %v2544_v43  ;;  %1943 = vmatprep.subr.bf16.mxu0 %v1942_v45  ;;  %v259_v40 = vld [vmem:[%s3287_s0 + $0x1a8] sm:$0xff]  ;;  %v261_v41 = vld [vmem:[%s3287_s0 + $0x1b8] sm:$0xff]  ;;  %v1960_v45 = vpack.c.bf16 %v256_v38, %v254_v37  ;;  %v856_v46 = vld [vmem:[%s3289_s2 + $0x50] sm:$0xff] }
  0x2e   : > { %2007 = vmatprep.subr.bf16.mxu1 %v2558_v48  ;;  %v857_v47 = vld [vmem:[%s3289_s2 + $0x58] sm:$0xff]  ;;  %v340_v49 = vld [vmem:[%s2556_s10 + $0x130] sm:$0xff]  ;;  %v1962_v50 = vpack.c.bf16 %v261_v41, %v259_v40  ;;  %v258_v51 = vld [vmem:[%s3287_s0 + $0x1a0] sm:$0xff] }
  0x2f   : > { %v260_v53 = vld [vmem:[%s3287_s0 + $0x1b0] sm:$0xff]  ;;  %v2684_v56 = vpack.c.bf16 %v857_v47, %v856_v46  ;;  %v859_v60 = vld [vmem:[%s3289_s2 + $0x68] sm:$0xff]  ;;  %v861_v11 = vld [vmem:[%s3289_s2 + $0x78] sm:$0xff] }
  0x30   : > { %696 = vmatmul.mubr.f32.vlgmr.msra.gmra.mrb[0].mxu1 %v328_v55  ;;  %1945 = vmatpush1.bf16.msra.mxu0 %v1944_v54  ;;  %v263_v54 = vld [vmem:[%s3287_s0 + $0x1c8] sm:$0xff]  ;;  %v265_v55 = vld [vmem:[%s3287_s0 + $0x1d8] sm:$0xff]  ;;  %v1964_v58 = vpack.c.bf16 %v260_v53, %v258_v51  ;;  %v264_v2 = vld [vmem:[%s3287_s0 + $0x1d0] sm:$0xff] }
  0x31   : > { %2009 = vmatpush3.bf16.msra.mxu1 %v2558_v48  ;;  %701 = vmatprep.mubr.f32.mxu1 %v2217_v7  ;;  %v343_v61 = vld [vmem:[%s2556_s10 + $0x148] sm:$0xff]  ;;  %v860_v10 = vld [vmem:[%s3289_s2 + $0x70] sm:$0xff]  ;;  %v346_v12 = vld [vmem:[%s2556_s10 + $0x160] sm:$0xff] }
  0x32   : > { %1947 = vmatprep.subr.bf16.mxu0 %v1946_v59  ;;  %2011 = vmatprep.subr.bf16.mxu1 %v2587_v62  ;;  %v858_v59 = vld [vmem:[%s3289_s2 + $0x60] sm:$0xff]  ;;  %v267_v3 = vld [vmem:[%s3287_s0 + $0x1e8] sm:$0xff]  ;;  %v268_v19 = vld [vmem:[%s3287_s0 + $0x1f0] sm:$0xff] }
  0x33   : > { %v2708_v6 = vpack.c.bf16 %v859_v60, %v858_v59  ;;  %v266_v17 = vld [vmem:[%s3287_s0 + $0x1e0] sm:$0xff]  ;;  %v349_v23 = vld [vmem:[%s2556_s10 + $0x178] sm:$0xff]  ;;  %v352_v25 = vld [vmem:[%s2556_s10 + $0x190] sm:$0xff] }
  0x34   : > { %702 = vmatmul.mubr.f32.gmra.mrb[2].mxu1 %v331_v63  ;;  %1949 = vmatpush1.bf16.msra.mxu0 %v1948_v1  ;;  %v1966_v63 = vpack.c.bf16 %v265_v55, %v263_v54  ;;  %v262_v1 = vld [vmem:[%s3287_s0 + $0x1c0] sm:$0xff]  ;;  %v355_v32 = vld [vmem:[%s2556_s10 + $0x1a8] sm:$0xff]  ;;  %v308_v33 = vld [vmem:[%s2556_s10 + $0x30] sm:$0xff] }
  0x35   : > { %707 = vmatprep.mubr.f32.mxu1 %v2217_v7  ;;  %1951 = vmatprep.subr.bf16.mxu0 %v1950_v4  ;;  %v269_v4 = vld [vmem:[%s3287_s0 + $0x1f8] sm:$0xff]  ;;  %v1968_v9 = vpack.c.bf16 %v264_v2, %v262_v1  ;;  %v302_v24 = vld [vmem:[%s2556_s10] sm:$0xff]  ;;  %v315_v37 = vld [vmem:[%s2556_s10 + $0x68] sm:$0xff] }
  0x36   : > { %2013 = vmatpush3.bf16.msra.mxu1 %v2587_v62  ;;  %v306_v27 = vld [vmem:[%s2556_s10 + $0x20] sm:$0xff]  ;;  %v321_v40 = vld [vmem:[%s2556_s10 + $0x98] sm:$0xff]  ;;  %v324_v41 = vld [vmem:[%s2556_s10 + $0xb0] sm:$0xff] }
  0x37   : > { %2015 = vmatprep.subr.bf16.mxu1 %v2612_v14  ;;  %v318_v38 = vld [vmem:[%s2556_s10 + $0x80] sm:$0xff]  ;;  %v800_v46 = vld [vmem:[%s2779_s9 + $0x10] sm:$0xff]  ;;  %v335_v55 = vld [vmem:[%s2556_s10 + $0x108] sm:$0xff] }
  0x38   : > { %708 = vmatmul.mubr.f32.gmra.mrb[4].mxu1 %v334_v20  ;;  %1953 = vmatpush1.bf16.msra.mxu0 %v1952_v16  ;;  %v1970_v16 = vpack.c.bf16 %v269_v4, %v267_v3  ;;  %v2726_v20 = vpack.c.bf16 %v861_v11, %v860_v10  ;;  %v330_v47 = vld [vmem:[%s2556_s10 + $0xe0] sm:$0xff]  ;;  %v808_v53 = vld [vmem:[%s2779_s9 + $0x50] sm:$0xff]  ;;  %v339_v59 = vld [vmem:[%s2556_s10 + $0x128] sm:$0xff] }
  0x39   : > { %713 = vmatprep.mubr.f32.mxu1 %v2217_v7  ;;  %1955 = vmatprep.subr.bf16.mxu0 %v1954_v22  ;;  %v1972_v22 = vpack.c.bf16 %v268_v19, %v266_v17  ;;  %v806_v51 = vld [vmem:[%s2779_s9 + $0x40] sm:$0xff]  ;;  %v336_v54 = vld [vmem:[%s2556_s10 + $0x110] sm:$0xff]  ;;  %v345_v3 = vld [vmem:[%s2556_s10 + $0x158] sm:$0xff] }
  0x3a   : > { %2017 = vmatpush3.bf16.msra.mxu1 %v2612_v14  ;;  %v338_v60 = vld [vmem:[%s2556_s10 + $0x120] sm:$0xff]  ;;  %v820_v2 = vld [vmem:[%s2779_s9 + $0xb0] sm:$0xff] }
  0x3b   : > { %2019 = vmatprep.subr.bf16.mxu1 %v2636_v28  ;;  %v818_v1 = vld [vmem:[%s2779_s9 + $0xa0] sm:$0xff]  ;;  %v348_v10 = vld [vmem:[%s2556_s10 + $0x170] sm:$0xff] }
  0x3c   : > { %714 = vmatmul.mubr.f32.gmra.mrb[6].mxu1 %v337_v34  ;;  %1957 = vmatpush1.bf16.msra.mxu0 %v1956_v30  ;;  %v305_v30 = vld [vmem:[%s2556_s10 + $0x18] sm:$0xff]  ;;  %v358_v34 = vld [vmem:[%s2556_s10 + $0x1c0] sm:$0xff]  ;;  %v832_v19 = vld [vmem:[%s2779_s9 + $0x110] sm:$0xff] }
  0x3d   : > { %719 = vmatprep.mubr.f32.mxu1 %v2217_v7  ;;  %1959 = vmatprep.subr.bf16.mxu0 %v1958_v36  ;;  %v361_v36 = vld [vmem:[%s2556_s10 + $0x1d8] sm:$0xff]  ;;  %v822_v4 = vld [vmem:[%s2779_s9 + $0xc0] sm:$0xff] }
  0x3e   : > { %2021 = vmatpush3.bf16.msra.mxu1 %v2636_v28  ;;  %v826_v11 = vld [vmem:[%s2779_s9 + $0xe0] sm:$0xff] }
  0x3f   : > { %2023 = vmatprep.subr.bf16.mxu1 %v2660_v42  ;;  %v830_v17 = vld [vmem:[%s2779_s9 + $0x100] sm:$0xff] }
  0x40   : > { %720 = vmatmul.mubr.f32.gmra.mrb[8].mxu1 %v340_v49  ;;  %1961 = vmatpush1.bf16.msra.mxu0 %v1960_v45  ;;  %v326_v45 = vld [vmem:[%s2556_s10 + $0xc0] sm:$0xff] }
  0x41   : > { %725 = vmatprep.mubr.f32.mxu1 %v2217_v7  ;;  %1963 = vmatprep.subr.bf16.mxu0 %v1962_v50  ;;  %v802_v49 = vld [vmem:[%s2779_s9 + $0x20] sm:$0xff]  ;;  %v333_v50 = vld [vmem:[%s2556_s10 + $0xf8] sm:$0xff] }
  0x42   : > { %2025 = vmatpush3.bf16.msra.mxu1 %v2660_v42 }
  0x43   : > { %2027 = vmatprep.subr.bf16.mxu1 %v2684_v56 }
  0x44   : > { %726 = vmatmul.mubr.f32.gmra.mrb[10].mxu1 %v343_v61  ;;  %1965 = vmatpush1.bf16.msra.mxu0 %v1964_v58  ;;  %v812_v58 = vld [vmem:[%s2779_s9 + $0x70] sm:$0xff] }
  0x45   : > { %731 = vmatprep.mubr.f32.mxu1 %v2217_v7  ;;  %1967 = vmatprep.subr.bf16.mxu0 %v1966_v63  ;;  %v816_v61 = vld [vmem:[%s2779_s9 + $0x90] sm:$0xff]  ;;  %v342_v63 = vld [vmem:[%s2556_s10 + $0x140] sm:$0xff] }
  0x46   : > { %2029 = vmatpush3.bf16.msra.mxu1 %v2684_v56 }
  0x47   : > { %2031 = vmatprep.subr.bf16.mxu1 %v2708_v6 }
  0x48   : > { %732 = vmatmul.mubr.f32.gmra.mrb[12].mxu1 %v346_v12  ;;  %1969 = vmatpush1.bf16.msra.mxu0 %v1968_v9  ;;  %v824_v9 = vld [vmem:[%s2779_s9 + $0xd0] sm:$0xff] }
  0x49   : > { %737 = vmatprep.mubr.f32.mxu1 %v2217_v7  ;;  %1971 = vmatprep.subr.bf16.mxu0 %v1970_v16  ;;  %v828_v12 = vld [vmem:[%s2779_s9 + $0xf0] sm:$0xff]  ;;  %v351_v16 = vld [vmem:[%s2556_s10 + $0x188] sm:$0xff] }
  0x4a   : > { %2033 = vmatpush3.bf16.msra.mxu1 %v2708_v6 }
  0x4b   : > { %2035 = vmatprep.subr.bf16.mxu1 %v2726_v20 }
  0x4c   : > { %738 = vmatmul.mubr.f32.gmra.mrb[14].mxu1 %v349_v23  ;;  %1973 = vmatpush1.bf16.msra.mxu0 %v1972_v22  ;;  %v354_v22 = vld [vmem:[%s2556_s10 + $0x1a0] sm:$0xff] }
  0x4d   : > { %743 = vmatprep.mubr.f32.mxu1 %v2217_v7  ;;  %1975 = vmatprep.subr.bf16.mxu0 %v2300_v8  ;;  %v309_v8 = vld [vmem:[%s2556_s10 + $0x38] sm:$0xff]  ;;  %v834_v23 = vld [vmem:[%s2779_s9 + $0x120] sm:$0xff] }
  0x4e   : > { %2037 = vmatpush3.bf16.msra.mxu1 %v2726_v20 }
  0x4f   : > { %439 = vmatmul.mubr.f32.vlgmr.msra.gmra.mrb[0].mxu0 %v302_v24  ;;  %2039 = vmatprep.subr.bf16.mxu1 %v2558_v48  ;;  %v836_v24 = vld [vmem:[%s2779_s9 + $0x130] sm:$0xff] }
  0x50   : > { %744 = vmatmul.mubr.f32.gmra.mrb[16].mxu1 %v352_v25  ;;  %1977 = vmatpush1.bf16.msra.mxu0 %v2311_v13  ;;  %v312_v13 = vld [vmem:[%s2556_s10 + $0x50] sm:$0xff]  ;;  %v357_v25 = vld [vmem:[%s2556_s10 + $0x1b8] sm:$0xff] }
  0x51   : > { %444 = vmatprep.mubr.f32.mxu0 %v306_v27  ;;  %749 = vmatprep.mubr.f32.mxu1 %v2217_v7  ;;  %v838_v27 = vld [vmem:[%s2779_s9 + $0x140] sm:$0xff] }
  0x52   : > { %1979 = vmatprep.subr.bf16.mxu0 %v2323_v18  ;;  %v311_v18 = vld [vmem:[%s2556_s10 + $0x48] sm:$0xff] }
  0x53   : > { %445 = vmatmul.mubr.f32.gmra.mrb[2].mxu0 %v305_v30  ;;  %v356_v30 = vld [vmem:[%s2556_s10 + $0x1b0] sm:$0xff] }
  0x54   : > { %750 = vmatmul.mubr.f32.gmra.mrb[18].mxu1 %v355_v32  ;;  %450 = vmatprep.mubr.f32.mxu0 %v309_v8  ;;  %v360_v32 = vld [vmem:[%s2556_s10 + $0x1d0] sm:$0xff]  ;;  %v842_v8 = vld [vmem:[%s2779_s9 + $0x160] sm:$0xff] }
  0x55   : > { %755 = vmatprep.mubr.f32.mxu1 %v2217_v7  ;;  %1981 = vmatpush1.bf16.msra.mxu0 %v2345_v26  ;;  %v314_v26 = vld [vmem:[%s2556_s10 + $0x60] sm:$0xff] }
  0x56   : > { %1983 = vmatprep.subr.bf16.mxu0 %v2356_v31  ;;  %v364_v31 = vld [vmem:[%s2556_s10 + $0x1f0] sm:$0xff] }
  0x57   : > { %451 = vmatmul.mubr.f32.gmra.mrb[4].mxu0 %v308_v33  ;;  %v359_v33 = vld [vmem:[%s2556_s10 + $0x1c8] sm:$0xff] }
  0x58   : > { %756 = vmatmul.mubr.f32.gmra.mrb[20].mxu1 %v358_v34  ;;  %456 = vmatprep.mubr.f32.mxu0 %v312_v13  ;;  %v844_v34 = vld [vmem:[%s2779_s9 + $0x170] sm:$0xff]  ;;  %v363_v13 = vld [vmem:[%s2556_s10 + $0x1e8] sm:$0xff] }
  0x59   : > { %761 = vmatprep.mubr.f32.mxu1 %v2217_v7  ;;  %1985 = vmatpush1.bf16.msra.mxu0 %v2377_v39  ;;  %v317_v39 = vld [vmem:[%s2556_s10 + $0x78] sm:$0xff] }
  0x5a   : > { %1987 = vmatprep.subr.bf16.mxu0 %v2389_v44  ;;  %v367_v44 = vld [vmem:[%s2556_s10 + $0x208] sm:$0xff] }
  0x5b   : > { %457 = vmatmul.mubr.f32.gmra.mrb[6].mxu0 %v311_v18  ;;  %v799_v18 = vld [vmem:[%s2779_s9 + $0x8] sm:$0xff] }
  0x5c   : > { %762 = vmatmul.mubr.f32.gmra.mrb[22].mxu1 %v361_v36  ;;  %462 = vmatprep.mubr.f32.mxu0 %v315_v37  ;;  %v362_v36 = vld [vmem:[%s2556_s10 + $0x1e0] sm:$0xff]  ;;  %v801_v37 = vld [vmem:[%s2779_s9 + $0x18] sm:$0xff] }
  0x5d   : > { %767 = vmatprep.mubr.f32.mxu1 %v2217_v7  ;;  %1989 = vmatpush1.bf16.msra.mxu0 %v2410_v52  ;;  %v320_v52 = vld [vmem:[%s2556_s10 + $0x90] sm:$0xff] }
  0x5e   : > { %1991 = vmatprep.subr.bf16.mxu0 %v2422_v57  ;;  %v370_v57 = vld [vmem:[%s2556_s10 + $0x220] sm:$0xff] }
  0x5f   : > { %463 = vmatmul.mubr.f32.gmra.mrb[8].mxu0 %v314_v26  ;;  %v366_v26 = vld [vmem:[%s2556_s10 + $0x200] sm:$0xff] }
  0x60   : > { %768 = vmatmul.mubr.f32.gmra.mrb[24].mxu1 %v364_v31  ;;  %468 = vmatprep.mubr.f32.mxu0 %v318_v38  ;;  %v803_v31 = vld [vmem:[%s2779_s9 + $0x28] sm:$0xff]  ;;  %v365_v38 = vld [vmem:[%s2556_s10 + $0x1f8] sm:$0xff] }
  0x61   : > { %773 = vmatprep.mubr.f32.mxu1 %v2217_v7  ;;  %1993 = vmatpush1.bf16.msra.mxu0 %v2441_v0  ;;  %v323_v0 = vld [vmem:[%s2556_s10 + $0xa8] sm:$0xff] }
  0x62   : > { %1995 = vmatprep.subr.bf16.mxu0 %v2453_v5  ;;  %v373_v5 = vld [vmem:[%s2556_s10 + $0x238] sm:$0xff] }
  0x63   : > { %469 = vmatmul.mubr.f32.gmra.mrb[10].mxu0 %v317_v39  ;;  %v805_v39 = vld [vmem:[%s2779_s9 + $0x38] sm:$0xff] }
  0x64   : > { %774 = vmatmul.mubr.f32.gmra.mrb[26].mxu1 %v367_v44  ;;  %474 = vmatprep.mubr.f32.mxu0 %v321_v40  ;;  %v369_v44 = vld [vmem:[%s2556_s10 + $0x218] sm:$0xff]  ;;  %v807_v40 = vld [vmem:[%s2779_s9 + $0x48] sm:$0xff] }
  0x65   : > { %779 = vmatprep.mubr.f32.mxu1 %v2217_v7  ;;  %1997 = vmatpush1.bf16.msra.mxu0 %v2477_v15  ;;  %v327_v15 = vld [vmem:[%s2556_s10 + $0xc8] sm:$0xff] }
  0x66   : > { %1999 = vmatprep.subr.bf16.mxu0 %v2489_v21  ;;  %v798_v21 = vld [vmem:[%s2779_s9] sm:$0xff] }
  0x67   : > { %475 = vmatmul.mubr.f32.gmra.mrb[12].mxu0 %v320_v52  ;;  %v368_v52 = vld [vmem:[%s2556_s10 + $0x210] sm:$0xff] }
  0x68   : > { %780 = vmatmul.mubr.f32.gmra.mrb[28].mxu1 %v370_v57  ;;  %480 = vmatprep.mubr.f32.mxu0 %v324_v41  ;;  %v809_v57 = vld [vmem:[%s2779_s9 + $0x58] sm:$0xff]  ;;  %v372_v41 = vld [vmem:[%s2556_s10 + $0x230] sm:$0xff] }
  0x69   : > { %785 = vmatprep.mubr.f32.mxu1 %v2217_v7  ;;  %2001 = vmatpush1.bf16.msra.mxu0 %v2513_v29  ;;  %v329_v29 = vld [vmem:[%s2556_s10 + $0xd8] sm:$0xff] }
  0x6a   : > { %2003 = vmatprep.subr.bf16.mxu0 %v2525_v35  ;;  %v804_v35 = vld [vmem:[%s2779_s9 + $0x30] sm:$0xff] }
  0x6b   : > { %481 = vmatmul.mubr.f32.gmra.mrb[14].mxu0 %v323_v0  ;;  %v811_v0 = vld [vmem:[%s2779_s9 + $0x68] sm:$0xff] }
  0x6c   : > { %786 = vmatmul.mubr.f32.gmra.mrb[30].mxu1 %v373_v5  ;;  %486 = vmatprep.mubr.f32.mxu0 %v327_v15  ;;  %v371_v5 = vld [vmem:[%s2556_s10 + $0x228] sm:$0xff]  ;;  %v813_v15 = vld [vmem:[%s2779_s9 + $0x78] sm:$0xff] }
  0x6d   : > { %1806 = vmatprep.mubr.f32.mxu1 %v798_v21  ;;  %2005 = vmatpush1.bf16.msra.mxu0 %v2544_v43  ;;  %v332_v43 = vld [vmem:[%s2556_s10 + $0xf0] sm:$0xff]  ;;  %v815_v21 = vld [vmem:[%s2779_s9 + $0x88] sm:$0xff] }
  0x6f   : > { %487 = vmatmul.mubr.f32.gmra.mrb[16].mxu0 %v326_v45  ;;  %v304_v45 = vld [vmem:[%s2556_s10 + $0x10] sm:$0xff] }
  0x70   : > { %1807 = vmatmul.mubr.f32.vlgmr.msra.gmra.mrb[32].mxu1 %v800_v46  ;;  %492 = vmatprep.mubr.f32.mxu0 %v330_v47  ;;  %v817_v46 = vld [vmem:[%s2779_s9 + $0x98] sm:$0xff]  ;;  %v819_v47 = vld [vmem:[%s2779_s9 + $0xa8] sm:$0xff] }
  0x71   : > { %2041 = vmatpush3.bf16.msra.mxu1 %v2558_v48  ;;  %1809 = vmatprep.mubr.f32.mxu1 %v802_v49  ;;  %v810_v48 = vld [vmem:[%s2779_s9 + $0x60] sm:$0xff]  ;;  %v307_v49 = vld [vmem:[%s2556_s10 + $0x28] sm:$0xff] }
  0x72   : > { %2043 = vmatprep.subr.bf16.mxu1 %v2587_v62 }
  0x73   : > { %493 = vmatmul.mubr.f32.gmra.mrb[18].mxu0 %v329_v29  ;;  %v821_v29 = vld [vmem:[%s2779_s9 + $0xb8] sm:$0xff] }
  0x74   : > { %1810 = vmatmul.mubr.f32.gmra.mrb[34].mxu1 %v804_v35  ;;  %498 = vmatprep.mubr.f32.mxu0 %v333_v50  ;;  %v823_v35 = vld [vmem:[%s2779_s9 + $0xc8] sm:$0xff]  ;;  %v310_v50 = vld [vmem:[%s2556_s10 + $0x40] sm:$0xff] }
  0x75   : > { %1812 = vmatprep.mubr.f32.mxu1 %v806_v51  ;;  %2045 = vmatpush3.bf16.msra.mxu1 %v2587_v62  ;;  %v814_v62 = vld [vmem:[%s2779_s9 + $0x80] sm:$0xff]  ;;  %v825_v51 = vld [vmem:[%s2779_s9 + $0xd8] sm:$0xff] }
  0x76   : > { %2047 = vmatprep.subr.bf16.mxu1 %v2612_v14 }
  0x77   : > { %499 = vmatmul.mubr.f32.gmra.mrb[20].mxu0 %v332_v43  ;;  %v827_v43 = vld [vmem:[%s2779_s9 + $0xe8] sm:$0xff] }
  0x78   : > { %1813 = vmatmul.mubr.f32.gmra.mrb[36].mxu1 %v808_v53  ;;  %504 = vmatprep.mubr.f32.mxu0 %v336_v54  ;;  %v313_v53 = vld [vmem:[%s2556_s10 + $0x58] sm:$0xff] }
  0x79   : > { %1815 = vmatprep.mubr.f32.mxu1 %v810_v48  ;;  %2049 = vmatpush3.bf16.msra.mxu1 %v2612_v14  ;;  %v341_v14 = vld [vmem:[%s2556_s10 + $0x138] sm:$0xff]  ;;  %v831_v48 = vld [vmem:[%s2779_s9 + $0x108] sm:$0xff] }
  0x7a   : > { %2051 = vmatprep.subr.bf16.mxu1 %v2636_v28  ;;  %v829_v54 = vld [vmem:[%s2779_s9 + $0xf8] sm:$0xff] }
  0x7b   : > { %505 = vmatmul.mubr.f32.gmra.mrb[22].mxu0 %v335_v55  ;;  %v316_v55 = vld [vmem:[%s2556_s10 + $0x70] sm:$0xff] }
  0x7c   : > { %1816 = vmatmul.mubr.f32.gmra.mrb[38].mxu1 %v812_v58  ;;  %510 = vmatprep.mubr.f32.mxu0 %v339_v59  ;;  %v833_v58 = vld [vmem:[%s2779_s9 + $0x118] sm:$0xff]  ;;  %v835_v59 = vld [vmem:[%s2779_s9 + $0x128] sm:$0xff] }
  0x7d   : > { %1818 = vmatprep.mubr.f32.mxu1 %v814_v62  ;;  %2053 = vmatpush3.bf16.msra.mxu1 %v2636_v28  ;;  %v344_v28 = vld [vmem:[%s2556_s10 + $0x150] sm:$0xff]  ;;  %v319_v62 = vld [vmem:[%s2556_s10 + $0x88] sm:$0xff] }
  0x7e   : > { %2055 = vmatprep.subr.bf16.mxu1 %v2660_v42 }
  0x7f   : > { %511 = vmatmul.mubr.f32.gmra.mrb[24].mxu0 %v338_v60  ;;  %v837_v60 = vld [vmem:[%s2779_s9 + $0x138] sm:$0xff] }
  0x80   : > { %1819 = vmatmul.mubr.f32.gmra.mrb[40].mxu1 %v816_v61  ;;  %516 = vmatprep.mubr.f32.mxu0 %v342_v63  ;;  %v839_v61 = vld [vmem:[%s2779_s9 + $0x148] sm:$0xff]  ;;  %v322_v63 = vld [vmem:[%s2556_s10 + $0xa0] sm:$0xff] }
  0x81   : > { %1821 = vmatprep.mubr.f32.mxu1 %v818_v1  ;;  %2057 = vmatpush3.bf16.msra.mxu1 %v2660_v42  ;;  %v347_v42 = vld [vmem:[%s2556_s10 + $0x168] sm:$0xff]  ;;  %v841_v1 = vld [vmem:[%s2779_s9 + $0x158] sm:$0xff] }
  0x82   : > { %2059 = vmatprep.subr.bf16.mxu1 %v2684_v56 }
  0x83   : > { %517 = vmatmul.mubr.f32.gmra.mrb[26].mxu0 %v341_v14  ;;  %v843_v14 = vld [vmem:[%s2779_s9 + $0x168] sm:$0xff] }
  0x84   : > { %1822 = vmatmul.mubr.f32.gmra.mrb[42].mxu1 %v820_v2  ;;  %522 = vmatprep.mubr.f32.mxu0 %v345_v3  ;;  %v325_v2 = vld [vmem:[%s2556_s10 + $0xb8] sm:$0xff] }
  0x85   : > { %1824 = vmatprep.mubr.f32.mxu1 %v822_v4  ;;  %2061 = vmatpush3.bf16.msra.mxu1 %v2684_v56  ;;  %v350_v56 = vld [vmem:[%s2556_s10 + $0x180] sm:$0xff]  ;;  %v845_v3 = vld [vmem:[%s2779_s9 + $0x178] sm:$0xff] }
  0x86   : > { %2063 = vmatprep.subr.bf16.mxu1 %v2708_v6 }
  0x87   : > { %523 = vmatmul.mubr.f32.gmra.mrb[28].mxu0 %v344_v28 }
  0x88   : > { %1825 = vmatmul.mubr.f32.gmra.mrb[44].mxu1 %v824_v9  ;;  %528 = vmatprep.mubr.f32.mxu0 %v348_v10 }
  0x89   : > { %1827 = vmatprep.mubr.f32.mxu1 %v826_v11  ;;  %2065 = vmatpush3.bf16.msra.mxu1 %v2708_v6  ;;  %v353_v6 = vld [vmem:[%s2556_s10 + $0x198] sm:$0xff]  ;;  %s189_s10 = sand.u32 1, %s2199_s12   ;;  %s1693_s12 = smul.u32 (%p2270_p3), 384, %s2207_s14 }
  0x8a   : > { %2067 = vmatprep.subr.bf16.mxu1 %v2726_v20  ;;  %s2134_s11 = smul.u32 768, %s189_s10 }
  0x8b   : > { %529 = vmatmul.mubr.f32.gmra.mrb[30].mxu0 %v347_v42  ;;  %s3084_s21 = scalar_lea.vmem (%p2270_p3), %s3290_s3, %s1693_s12 }
  0x8c   : > { %1828 = vmatmul.mubr.f32.gmra.mrb[46].mxu1 %v828_v12  ;;  %534 = vmatprep.mubr.f32.mxu0 %v351_v16  ;;  %s2949_s17 = scalar_lea.vmem [#allocation2], %s2134_s11 }
  0x8d   : > { %1830 = vmatprep.mubr.f32.mxu1 %v830_v17  ;;  %2069 = vmatpush3.bf16.msra.mxu1 %v2726_v20  ;;  %v840_v20 = vld [vmem:[%s2779_s9 + $0x150] sm:$0xff] }
  0x8f   : > { %535 = vmatmul.mubr.f32.gmra.mrb[32].mxu0 %v350_v56 }
  0x90   : > { %1831 = vmatmul.mubr.f32.gmra.mrb[48].mxu1 %v832_v19  ;;  %540 = vmatprep.mubr.f32.mxu0 %v354_v22 }
  0x91   : > { %1833 = vmatprep.mubr.f32.mxu1 %v834_v23 }
  0x93   : > { %541 = vmatmul.mubr.f32.gmra.mrb[34].mxu0 %v353_v6 }
  0x94   : > { %1834 = vmatmul.mubr.f32.gmra.mrb[50].mxu1 %v836_v24  ;;  %546 = vmatprep.mubr.f32.mxu0 %v357_v25 }
  0x95   : > { %1836 = vmatprep.mubr.f32.mxu1 %v838_v27 }
  0x97   : > { %547 = vmatmul.mubr.f32.gmra.mrb[36].mxu0 %v356_v30 }
  0x98   : > { %1837 = vmatmul.mubr.f32.gmra.mrb[52].mxu1 %v840_v20  ;;  %552 = vmatprep.mubr.f32.mxu0 %v360_v32 }
  0x99   : > { %1839 = vmatprep.mubr.f32.mxu1 %v842_v8 }
  0x9b   : > { %553 = vmatmul.mubr.f32.gmra.mrb[38].mxu0 %v359_v33 }
  0x9c   : > { %1840 = vmatmul.mubr.f32.gmra.mrb[54].mxu1 %v844_v34  ;;  %558 = vmatprep.mubr.f32.mxu0 %v363_v13 }
  0x9d   : > { %1874 = vmatprep.mubr.f32.mxu1 %v799_v18 }
  0x9f   : > { %559 = vmatmul.mubr.f32.gmra.mrb[40].mxu0 %v362_v36 }
  0xa0   : > { %1875 = vmatmul.mubr.f32.vlgmr.msra.gmra.mrb[56].mxu1 %v801_v37  ;;  %564 = vmatprep.mubr.f32.mxu0 %v366_v26 }
  0xa1   : > { %1877 = vmatprep.mubr.f32.mxu1 %v803_v31 }
  0xa3   : > { %565 = vmatmul.mubr.f32.gmra.mrb[42].mxu0 %v365_v38 }
  0xa4   : > { %1878 = vmatmul.mubr.f32.gmra.mrb[58].mxu1 %v805_v39  ;;  %570 = vmatprep.mubr.f32.mxu0 %v369_v44 }
  0xa5   : > { %1880 = vmatprep.mubr.f32.mxu1 %v807_v40 }
  0xa7   : > { %571 = vmatmul.mubr.f32.gmra.mrb[44].mxu0 %v368_v52 }
  0xa8   : > { %1881 = vmatmul.mubr.f32.gmra.mrb[60].mxu1 %v809_v57  ;;  %576 = vmatprep.mubr.f32.mxu0 %v372_v41 }
  0xa9   : > { %1883 = vmatprep.mubr.f32.mxu1 %v811_v0 }
  0xab   : > { %577 = vmatmul.mubr.f32.gmra.mrb[46].mxu0 %v371_v5 }
  0xac   : > { %1884 = vmatmul.mubr.f32.gmra.mrb[62].mxu1 %v813_v15  ;;  %647 = vmatprep.mubr.f32.mxu0 %v2217_v7 }
  0xad   : > { %1886 = vmatprep.mubr.f32.mxu1 %v815_v21 }
  0xaf   : > { %648 = vmatmul.mubr.f32.vlgmr.msra.gmra.mrb[0].mxu0 %v304_v45 }
  0xb0   : > { %1887 = vmatmul.mubr.f32.gmra.mrb[64].mxu1 %v817_v46  ;;  %653 = vmatprep.mubr.f32.mxu0 %v2217_v7 }
  0xb1   : > { %1889 = vmatprep.mubr.f32.mxu1 %v819_v47 }
  0xb3   : > { %654 = vmatmul.mubr.f32.gmra.mrb[2].mxu0 %v307_v49 }
  0xb4   : > { %1890 = vmatmul.mubr.f32.gmra.mrb[66].mxu1 %v821_v29  ;;  %659 = vmatprep.mubr.f32.mxu0 %v2217_v7 }
  0xb5   : > { %1892 = vmatprep.mubr.f32.mxu1 %v823_v35 }
  0xb7   : > { %660 = vmatmul.mubr.f32.gmra.mrb[4].mxu0 %v310_v50 }
  0xb8   : > { %1893 = vmatmul.mubr.f32.gmra.mrb[68].mxu1 %v825_v51  ;;  %665 = vmatprep.mubr.f32.mxu0 %v2217_v7 }
  0xb9   : > { %1895 = vmatprep.mubr.f32.mxu1 %v827_v43 }
  0xbb   : > { %666 = vmatmul.mubr.f32.gmra.mrb[6].mxu0 %v313_v53 }
  0xbc   : > { %1896 = vmatmul.mubr.f32.gmra.mrb[70].mxu1 %v829_v54  ;;  %671 = vmatprep.mubr.f32.mxu0 %v2217_v7 }
  0xbd   : > { %1898 = vmatprep.mubr.f32.mxu1 %v831_v48 }
  0xbf   : > { %672 = vmatmul.mubr.f32.gmra.mrb[8].mxu0 %v316_v55 }
  0xc0   : > { %1899 = vmatmul.mubr.f32.gmra.mrb[72].mxu1 %v833_v58  ;;  %677 = vmatprep.mubr.f32.mxu0 %v2217_v7 }
  0xc1   : > { %1901 = vmatprep.mubr.f32.mxu1 %v835_v59 }
  0xc3   : > { %678 = vmatmul.mubr.f32.gmra.mrb[10].mxu0 %v319_v62 }
  0xc4   : > { %1902 = vmatmul.mubr.f32.gmra.mrb[74].mxu1 %v837_v60  ;;  %683 = vmatprep.mubr.f32.mxu0 %v2217_v7 }
  0xc5   : > { %1904 = vmatprep.mubr.f32.mxu1 %v839_v61 }
  0xc7   : > { %684 = vmatmul.mubr.f32.gmra.mrb[12].mxu0 %v322_v63 }
  0xc8   : > { %1905 = vmatmul.mubr.f32.gmra.mrb[76].mxu1 %v841_v1  ;;  %689 = vmatprep.mubr.f32.mxu0 %v2217_v7 }
  0xc9   : > { %1907 = vmatprep.mubr.f32.mxu1 %v843_v14 }
  0xcb   : > { %690 = vmatmul.mubr.f32.gmra.mrb[14].mxu0 %v325_v2 }
  0xcc   : > { %1908 = vmatmul.mubr.f32.gmra.mrb[78].mxu1 %v845_v3 }
 0x103   : > { %v697_v4 = vpop.f32.mrb[0].mxu1 }
 0x104   : > { %v699_v28 = vpop.f32.mrb[1].mxu1 }
 0x107   : > { %v703_v9 = vpop.f32.mrb[2].mxu1 }
 0x108   : > { %v705_v10 = vpop.f32.mrb[3].mxu1 }
 0x10b   : > { %v709_v11 = vpop.f32.mrb[4].mxu1 }
 0x10c   : > { %v711_v42 = vpop.f32.mrb[5].mxu1 }
 0x10f   : > { %v715_v12 = vpop.f32.mrb[6].mxu1 }
 0x110   : > { %v2898_v16 = vpop.f32.mrb[7].mxu1 }
 0x113   : > { %v2900_v17 = vpop.f32.mrb[8].mxu1 }
 0x114   : > { %v2902_v56 = vpop.f32.mrb[9].mxu1 }
 0x117   : > { %v2904_v19 = vpop.f32.mrb[10].mxu1 }
 0x118   : > { %v2906_v7 = vpop.f32.mrb[11].mxu1 }
 0x11b   : > { %v2908_v22 = vpop.f32.mrb[12].mxu1 }
 0x11c   : > { %v2910_v23 = vpop.f32.mrb[13].mxu1 }
 0x11f   : > { %v2912_v6 = vpop.f32.mrb[14].mxu1 }
 0x120   : > { %v2914_v24 = vpop.f32.mrb[15].mxu1 }
 0x123   : > { %v2916_v25 = vpop.f32.mrb[16].mxu1 }
 0x124   : > { %v2918_v27 = vpop.f32.mrb[17].mxu1 }
 0x127   : > { %v2920_v30 = vpop.f32.mrb[18].mxu1 }
 0x128   : > { %v2922_v20 = vpop.f32.mrb[19].mxu1 }
 0x12b   : > { %v2924_v32 = vpop.f32.mrb[20].mxu1 }
 0x12c   : > { %v2926_v8 = vpop.f32.mrb[21].mxu1 }
 0x12f   : > { %v2928_v33 = vpop.f32.mrb[22].mxu1 }
 0x130   : > { %v2930_v34 = vpop.f32.mrb[23].mxu1 }
 0x133   : > { %v2932_v13 = vpop.f32.mrb[24].mxu1 }
 0x134   : > { %v2934_v18 = vpop.f32.mrb[25].mxu1 }
 0x137   : > { %v2936_v36 = vpop.f32.mrb[26].mxu1 }
 0x138   : > { %v2938_v37 = vpop.f32.mrb[27].mxu1 }
 0x13b   : > { %v2941_v26 = vpop.f32.mrb[28].mxu1 }
 0x13c   : > { %v2943_v31 = vpop.f32.mrb[29].mxu1 }
 0x13f   : > { %v2945_v38 = vpop.f32.mrb[30].mxu1 }
 0x140   : > { %v2947_v39 = vpop.f32.mrb[31].mxu1 }
 0x142   : > { %v488_v44 = vpop.f32.mrb[16].mxu0 }
 0x143   : > { %v698_v40 = vadd.f32 %v697_v4, %v488_v44  ;;  %v1808_v52 = vpop.f32.mrb[32].mxu1  ;;  %v490_v57 = vpop.f32.mrb[17].mxu0 }
 0x144   : > { %1282 = vst [vmem:[%s2949_s17 + $0x18] sm:$0xff] %v1808_v52  ;;  %v700_v41 = vadd.f32 %v699_v28, %v490_v57  ;;  %v928_v0 = vpop.f32.mrb[33].mxu1 }
 0x145   : > { %1240 = vst [vmem:[%s2949_s17 + $0x80] sm:$0xff] %v698_v40  ;;  %1281 = vst [vmem:[%s2949_s17 + $0x8] sm:$0xff] %v928_v0 }
 0x146   : > { %1646 = vst [vmem:[%s2949_s17 + $0x200] sm:$0xff] %v700_v41  ;;  %v494_v5 = vpop.f32.mrb[18].mxu0 }
 0x147   : > { %v704_v15 = vadd.f32 %v703_v9, %v494_v5  ;;  %v1811_v21 = vpop.f32.mrb[34].mxu1  ;;  %v496_v45 = vpop.f32.mrb[19].mxu0 }
 0x148   : > { %1284 = vst [vmem:[%s2949_s17 + $0x38] sm:$0xff] %v1811_v21  ;;  %v706_v46 = vadd.f32 %v705_v10, %v496_v45  ;;  %v938_v47 = vpop.f32.mrb[35].mxu1 }
 0x149   : > { %1241 = vst [vmem:[%s2949_s17 + $0x90] sm:$0xff] %v704_v15  ;;  %1283 = vst [vmem:[%s2949_s17 + $0x28] sm:$0xff] %v938_v47 }
 0x14a   : > { %1647 = vst [vmem:[%s2949_s17 + $0x210] sm:$0xff] %v706_v46  ;;  %v500_v49 = vpop.f32.mrb[20].mxu0 }
 0x14b   : > { %v710_v29 = vadd.f32 %v709_v11, %v500_v49  ;;  %v1814_v35 = vpop.f32.mrb[36].mxu1  ;;  %v502_v50 = vpop.f32.mrb[21].mxu0 }
 0x14c   : > { %1286 = vst [vmem:[%s2949_s17 + $0x58] sm:$0xff] %v1814_v35  ;;  %v712_v51 = vadd.f32 %v711_v42, %v502_v50  ;;  %v948_v43 = vpop.f32.mrb[37].mxu1 }
 0x14d   : > { %1242 = vst [vmem:[%s2949_s17 + $0xa0] sm:$0xff] %v710_v29  ;;  %1285 = vst [vmem:[%s2949_s17 + $0x48] sm:$0xff] %v948_v43 }
 0x14e   : > { %1648 = vst [vmem:[%s2949_s17 + $0x220] sm:$0xff] %v712_v51  ;;  %v506_v53 = vpop.f32.mrb[22].mxu0 }
 0x14f   : > { %v716_v54 = vadd.f32 %v715_v12, %v506_v53  ;;  %v1817_v48 = vpop.f32.mrb[38].mxu1  ;;  %v508_v55 = vpop.f32.mrb[23].mxu0 }
 0x150   : > { %1288 = vst [vmem:[%s2949_s17 + $0x78] sm:$0xff] %v1817_v48  ;;  %v718_v58 = vadd.f32 %v2898_v16, %v508_v55  ;;  %v958_v59 = vpop.f32.mrb[39].mxu1 }
 0x151   : > { %1243 = vst [vmem:[%s2949_s17 + $0xb0] sm:$0xff] %v716_v54  ;;  %1287 = vst [vmem:[%s2949_s17 + $0x68] sm:$0xff] %v958_v59 }
 0x152   : > { %1649 = vst [vmem:[%s2949_s17 + $0x230] sm:$0xff] %v718_v58  ;;  %v512_v62 = vpop.f32.mrb[24].mxu0 }
 0x153   : > { %v722_v60 = vadd.f32 %v2900_v17, %v512_v62  ;;  %v1820_v61 = vpop.f32.mrb[40].mxu1  ;;  %v514_v63 = vpop.f32.mrb[25].mxu0 }
 0x154   : > { %1290 = vst [vmem:[%s2949_s17 + $0x98] sm:$0xff] %v1820_v61  ;;  %v724_v1 = vadd.f32 %v2902_v56, %v514_v63  ;;  %v968_v14 = vpop.f32.mrb[41].mxu1 }
 0x155   : > { %1244 = vst [vmem:[%s2949_s17 + $0xc0] sm:$0xff] %v722_v60  ;;  %1289 = vst [vmem:[%s2949_s17 + $0x88] sm:$0xff] %v968_v14 }
 0x156   : > { %1650 = vst [vmem:[%s2949_s17 + $0x240] sm:$0xff] %v724_v1  ;;  %v518_v2 = vpop.f32.mrb[26].mxu0 }
 0x157   : > { %v728_v3 = vadd.f32 %v2904_v19, %v518_v2  ;;  %v1823_v4 = vpop.f32.mrb[42].mxu1  ;;  %v520_v28 = vpop.f32.mrb[27].mxu0 }
 0x158   : > { %1292 = vst [vmem:[%s2949_s17 + $0xb8] sm:$0xff] %v1823_v4  ;;  %v730_v9 = vadd.f32 %v2906_v7, %v520_v28  ;;  %v978_v10 = vpop.f32.mrb[43].mxu1 }
 0x159   : > { %1245 = vst [vmem:[%s2949_s17 + $0xd0] sm:$0xff] %v728_v3  ;;  %1291 = vst [vmem:[%s2949_s17 + $0xa8] sm:$0xff] %v978_v10 }
 0x15a   : > { %1651 = vst [vmem:[%s2949_s17 + $0x250] sm:$0xff] %v730_v9  ;;  %v524_v11 = vpop.f32.mrb[28].mxu0 }
 0x15b   : > { %v734_v42 = vadd.f32 %v2908_v22, %v524_v11  ;;  %v1826_v12 = vpop.f32.mrb[44].mxu1  ;;  %v526_v16 = vpop.f32.mrb[29].mxu0 }
 0x15c   : > { %1294 = vst [vmem:[%s2949_s17 + $0xd8] sm:$0xff] %v1826_v12  ;;  %v736_v17 = vadd.f32 %v2910_v23, %v526_v16  ;;  %v988_v56 = vpop.f32.mrb[45].mxu1 }
 0x15d   : > { %1246 = vst [vmem:[%s2949_s17 + $0xe0] sm:$0xff] %v734_v42  ;;  %1293 = vst [vmem:[%s2949_s17 + $0xc8] sm:$0xff] %v988_v56 }
 0x15e   : > { %1652 = vst [vmem:[%s2949_s17 + $0x260] sm:$0xff] %v736_v17  ;;  %v530_v19 = vpop.f32.mrb[30].mxu0 }
 0x15f   : > { %v740_v7 = vadd.f32 %v2912_v6, %v530_v19  ;;  %v1829_v44 = vpop.f32.mrb[46].mxu1  ;;  %v532_v22 = vpop.f32.mrb[31].mxu0 }
 0x160   : > { %1296 = vst [vmem:[%s2949_s17 + $0xf8] sm:$0xff] %v1829_v44  ;;  %v742_v40 = vadd.f32 %v2914_v24, %v532_v22  ;;  %v998_v52 = vpop.f32.mrb[47].mxu1 }
 0x161   : > { %1247 = vst [vmem:[%s2949_s17 + $0xf0] sm:$0xff] %v740_v7  ;;  %1295 = vst [vmem:[%s2949_s17 + $0xe8] sm:$0xff] %v998_v52 }
 0x162   : > { %1653 = vst [vmem:[%s2949_s17 + $0x270] sm:$0xff] %v742_v40  ;;  %v536_v23 = vpop.f32.mrb[32].mxu0 }
 0x163   : > { %v746_v57 = vadd.f32 %v2916_v25, %v536_v23  ;;  %v1832_v41 = vpop.f32.mrb[48].mxu1  ;;  %v538_v6 = vpop.f32.mrb[33].mxu0 }
 0x164   : > { %1298 = vst [vmem:[%s2949_s17 + $0x118] sm:$0xff] %v1832_v41  ;;  %v748_v0 = vadd.f32 %v2918_v27, %v538_v6  ;;  %v1008_v5 = vpop.f32.mrb[49].mxu1 }
 0x165   : > { %1248 = vst [vmem:[%s2949_s17 + $0x100] sm:$0xff] %v746_v57  ;;  %1297 = vst [vmem:[%s2949_s17 + $0x108] sm:$0xff] %v1008_v5 }
 0x166   : > { %1654 = vst [vmem:[%s2949_s17 + $0x280] sm:$0xff] %v748_v0  ;;  %v542_v24 = vpop.f32.mrb[34].mxu0 }
 0x167   : > { %v752_v15 = vadd.f32 %v2920_v30, %v542_v24  ;;  %v1835_v21 = vpop.f32.mrb[50].mxu1  ;;  %v544_v25 = vpop.f32.mrb[35].mxu0 }
 0x168   : > { %1300 = vst [vmem:[%s2949_s17 + $0x138] sm:$0xff] %v1835_v21  ;;  %v754_v45 = vadd.f32 %v2922_v20, %v544_v25  ;;  %v1018_v46 = vpop.f32.mrb[51].mxu1 }
 0x169   : > { %1249 = vst [vmem:[%s2949_s17 + $0x110] sm:$0xff] %v752_v15  ;;  %1299 = vst [vmem:[%s2949_s17 + $0x128] sm:$0xff] %v1018_v46 }
 0x16a   : > { %1655 = vst [vmem:[%s2949_s17 + $0x290] sm:$0xff] %v754_v45  ;;  %v548_v27 = vpop.f32.mrb[36].mxu0 }
 0x16b   : > { %v758_v47 = vadd.f32 %v2924_v32, %v548_v27  ;;  %v1838_v49 = vpop.f32.mrb[52].mxu1  ;;  %v550_v30 = vpop.f32.mrb[37].mxu0 }
 0x16c   : > { %1302 = vst [vmem:[%s2949_s17 + $0x158] sm:$0xff] %v1838_v49  ;;  %v760_v29 = vadd.f32 %v2926_v8, %v550_v30  ;;  %v1028_v35 = vpop.f32.mrb[53].mxu1 }
 0x16d   : > { %1250 = vst [vmem:[%s2949_s17 + $0x120] sm:$0xff] %v758_v47  ;;  %1301 = vst [vmem:[%s2949_s17 + $0x148] sm:$0xff] %v1028_v35  ;;  %v1357_v35 = vld [vmem:[%s2949_s17 + $0x8] sm:$0xff] (%p2270_p3) }
 0x16e   : > { %1656 = vst [vmem:[%s2949_s17 + $0x2a0] sm:$0xff] %v760_v29  ;;  %v554_v20 = vpop.f32.mrb[38].mxu0  ;;  %1358 = vst [vmem:[%s3084_s21 + $0x8] sm:$0xff] (%p2270_p3), %v1357_v35 }
 0x16f   : > { %v764_v50 = vadd.f32 %v2928_v33, %v554_v20  ;;  %v1841_v51 = vpop.f32.mrb[54].mxu1  ;;  %v556_v32 = vpop.f32.mrb[39].mxu0 }
 0x170   : > { %1304 = vst [vmem:[%s2949_s17 + $0x178] sm:$0xff] %v1841_v51  ;;  %v766_v43 = vadd.f32 %v2930_v34, %v556_v32  ;;  %v1038_v53 = vpop.f32.mrb[55].mxu1  ;;  %v1365_v32 = vld [vmem:[%s2949_s17 + $0x28] sm:$0xff] (%p2270_p3) }
 0x171   : > { %1251 = vst [vmem:[%s2949_s17 + $0x130] sm:$0xff] %v764_v50  ;;  %1303 = vst [vmem:[%s2949_s17 + $0x168] sm:$0xff] %v1038_v53  ;;  %v1361_v50 = vld [vmem:[%s2949_s17 + $0x18] sm:$0xff] (%p2270_p3) }
 0x172   : > { %1657 = vst [vmem:[%s2949_s17 + $0x2b0] sm:$0xff] %v766_v43  ;;  %v560_v8 = vpop.f32.mrb[40].mxu0  ;;  %v1369_v53 = vld [vmem:[%s2949_s17 + $0x38] sm:$0xff] (%p2270_p3)  ;;  %1362 = vst [vmem:[%s3084_s21 + $0x18] sm:$0xff] (%p2270_p3), %v1361_v50 }
 0x173   : > { %v770_v54 = vadd.f32 %v2932_v13, %v560_v8  ;;  %v1876_v48 = vpop.f32.mrb[56].mxu1  ;;  %v562_v33 = vpop.f32.mrb[41].mxu0  ;;  %1366 = vst [vmem:[%s3084_s21 + $0x28] sm:$0xff] (%p2270_p3), %v1365_v32  ;;  %1370 = vst [vmem:[%s3084_s21 + $0x38] sm:$0xff] (%p2270_p3), %v1369_v53 }
 0x174   : > { %1663 = vst [vmem:[%s2949_s17 + $0x198] sm:$0xff] %v1876_v48  ;;  %v772_v55 = vadd.f32 %v2934_v18, %v562_v33  ;;  %v1113_v58 = vpop.f32.mrb[57].mxu1  ;;  %v1377_v33 = vld [vmem:[%s2949_s17 + $0x58] sm:$0xff] (%p2270_p3) }
 0x175   : > { %1252 = vst [vmem:[%s2949_s17 + $0x140] sm:$0xff] %v770_v54  ;;  %1662 = vst [vmem:[%s2949_s17 + $0x188] sm:$0xff] %v1113_v58  ;;  %v1373_v54 = vld [vmem:[%s2949_s17 + $0x48] sm:$0xff] (%p2270_p3) }
 0x176   : > { %1658 = vst [vmem:[%s2949_s17 + $0x2c0] sm:$0xff] %v772_v55  ;;  %v566_v34 = vpop.f32.mrb[42].mxu0  ;;  %1374 = vst [vmem:[%s3084_s21 + $0x48] sm:$0xff] (%p2270_p3), %v1373_v54  ;;  %v1381_v58 = vld [vmem:[%s2949_s17 + $0x68] sm:$0xff] (%p2270_p3) }
 0x177   : > { %v776_v59 = vadd.f32 %v2936_v36, %v566_v34  ;;  %v1879_v62 = vpop.f32.mrb[58].mxu1  ;;  %v568_v13 = vpop.f32.mrb[43].mxu0  ;;  %1378 = vst [vmem:[%s3084_s21 + $0x58] sm:$0xff] (%p2270_p3), %v1377_v33  ;;  %1382 = vst [vmem:[%s3084_s21 + $0x68] sm:$0xff] (%p2270_p3), %v1381_v58 }
 0x178   : > { %1665 = vst [vmem:[%s2949_s17 + $0x1b8] sm:$0xff] %v1879_v62  ;;  %v778_v60 = vadd.f32 %v2938_v37, %v568_v13  ;;  %v1123_v61 = vpop.f32.mrb[59].mxu1  ;;  %v1387_v62 = vld [vmem:[%s2949_s17 + $0x80] sm:$0xff] (%p2270_p3)  ;;  %v1389_v13 = vld [vmem:[%s2949_s17 + $0x88] sm:$0xff] (%p2270_p3) }
 0x179   : > { %1253 = vst [vmem:[%s2949_s17 + $0x150] sm:$0xff] %v776_v59  ;;  %1664 = vst [vmem:[%s2949_s17 + $0x1a8] sm:$0xff] %v1123_v61  ;;  %v1385_v59 = vld [vmem:[%s2949_s17 + $0x78] sm:$0xff] (%p2270_p3) }
 0x17a   : > { %1659 = vst [vmem:[%s2949_s17 + $0x2d0] sm:$0xff] %v778_v60  ;;  %v572_v18 = vpop.f32.mrb[44].mxu0  ;;  %1386 = vst [vmem:[%s3084_s21 + $0x78] sm:$0xff] (%p2270_p3), %v1385_v59  ;;  %v1391_v60 = vld [vmem:[%s2949_s17 + $0x90] sm:$0xff] (%p2270_p3)  ;;  %v1393_v61 = vld [vmem:[%s2949_s17 + $0x98] sm:$0xff] (%p2270_p3) }
 0x17b   : > { %v782_v63 = vadd.f32 %v2941_v26, %v572_v18  ;;  %v1882_v1 = vpop.f32.mrb[60].mxu1  ;;  %v574_v36 = vpop.f32.mrb[45].mxu0  ;;  %1388 = vst [vmem:[%s3084_s21 + $0x80] sm:$0xff] (%p2270_p3), %v1387_v62  ;;  %1390 = vst [vmem:[%s3084_s21 + $0x88] sm:$0xff] (%p2270_p3), %v1389_v13  ;;  %v1395_v18 = vld [vmem:[%s2949_s17 + $0xa0] sm:$0xff] (%p2270_p3) }
 0x17c   : > { %1667 = vst [vmem:[%s2949_s17 + $0x1d8] sm:$0xff] %v1882_v1  ;;  %v784_v14 = vadd.f32 %v2943_v31, %v574_v36  ;;  %v1133_v2 = vpop.f32.mrb[61].mxu1  ;;  %1392 = vst [vmem:[%s3084_s21 + $0x90] sm:$0xff] (%p2270_p3), %v1391_v60  ;;  %v1399_v1 = vld [vmem:[%s2949_s17 + $0xb0] sm:$0xff] (%p2270_p3)  ;;  %v1401_v36 = vld [vmem:[%s2949_s17 + $0xb8] sm:$0xff] (%p2270_p3) }
 0x17d   : > { %1254 = vst [vmem:[%s2949_s17 + $0x160] sm:$0xff] %v782_v63  ;;  %1666 = vst [vmem:[%s2949_s17 + $0x1c8] sm:$0xff] %v1133_v2  ;;  %v1397_v63 = vld [vmem:[%s2949_s17 + $0xa8] sm:$0xff] (%p2270_p3)  ;;  %v1515_v62 = vld [vmem:[%s2949_s17 + $0x280] sm:$0xff] (%p2270_p3) }
 0x17e   : > { %1660 = vst [vmem:[%s2949_s17 + $0x2e0] sm:$0xff] %v784_v14  ;;  %v578_v37 = vpop.f32.mrb[46].mxu0  ;;  %1394 = vst [vmem:[%s3084_s21 + $0x98] sm:$0xff] (%p2270_p3), %v1393_v61  ;;  %v1403_v14 = vld [vmem:[%s2949_s17 + $0xc0] sm:$0xff] (%p2270_p3)  ;;  %v1405_v2 = vld [vmem:[%s2949_s17 + $0xc8] sm:$0xff] (%p2270_p3) }
 0x17f   : > { %v788_v3 = vadd.f32 %v2945_v38, %v578_v37  ;;  %v1885_v26 = vpop.f32.mrb[62].mxu1  ;;  %v580_v4 = vpop.f32.mrb[47].mxu0  ;;  %1396 = vst [vmem:[%s3084_s21 + $0xa0] sm:$0xff] (%p2270_p3), %v1395_v18  ;;  %1398 = vst [vmem:[%s3084_s21 + $0xa8] sm:$0xff] (%p2270_p3), %v1397_v63  ;;  %v1407_v37 = vld [vmem:[%s2949_s17 + $0xd0] sm:$0xff] (%p2270_p3)  ;;  %v1523_v18 = vld [vmem:[%s2949_s17 + $0x2a0] sm:$0xff] (%p2270_p3) }
 0x180   : > { %1669 = vst [vmem:[%s2949_s17 + $0x1f8] sm:$0xff] %v1885_v26  ;;  %v790_v28 = vadd.f32 %v2947_v39, %v580_v4  ;;  %v1143_v9 = vpop.f32.mrb[63].mxu1  ;;  %1400 = vst [vmem:[%s3084_s21 + $0xb0] sm:$0xff] (%p2270_p3), %v1399_v1  ;;  %v1411_v26 = vld [vmem:[%s2949_s17 + $0xe0] sm:$0xff] (%p2270_p3)  ;;  %v1413_v4 = vld [vmem:[%s2949_s17 + $0xe8] sm:$0xff] (%p2270_p3) }
 0x181   : > { %1255 = vst [vmem:[%s2949_s17 + $0x170] sm:$0xff] %v788_v3  ;;  %1668 = vst [vmem:[%s2949_s17 + $0x1e8] sm:$0xff] %v1143_v9  ;;  %v1409_v3 = vld [vmem:[%s2949_s17 + $0xd8] sm:$0xff] (%p2270_p3)  ;;  %v1519_v60 = vld [vmem:[%s2949_s17 + $0x290] sm:$0xff] (%p2270_p3) }
 0x182   : > { %1661 = vst [vmem:[%s2949_s17 + $0x2f0] sm:$0xff] %v790_v28  ;;  %v649_v31 = vpop.f32.mrb[0].mxu0  ;;  %1402 = vst [vmem:[%s3084_s21 + $0xb8] sm:$0xff] (%p2270_p3), %v1401_v36  ;;  %v1415_v28 = vld [vmem:[%s2949_s17 + $0xf0] sm:$0xff] (%p2270_p3)  ;;  %v1417_v9 = vld [vmem:[%s2949_s17 + $0xf8] sm:$0xff] (%p2270_p3) }
 0x183   : > { %1232 = vst [vmem:[%s2949_s17] sm:$0xff] %v649_v31  ;;  %v1888_v10 = vpop.f32.mrb[64].mxu1  ;;  %v651_v11 = vpop.f32.mrb[1].mxu0  ;;  %1404 = vst [vmem:[%s3084_s21 + $0xc0] sm:$0xff] (%p2270_p3), %v1403_v14  ;;  %v1419_v31 = vld [vmem:[%s2949_s17 + $0x100] sm:$0xff] (%p2270_p3)  ;;  %v1527_v1 = vld [vmem:[%s2949_s17 + $0x2b0] sm:$0xff] (%p2270_p3) }
 0x184   : > { %1671 = vst [vmem:[%s2949_s17 + $0x218] sm:$0xff] %v1888_v10  ;;  %1638 = vst [vmem:[%s2949_s17 + $0x180] sm:$0xff] %v651_v11  ;;  %v1153_v38 = vpop.f32.mrb[65].mxu1  ;;  %v1421_v10 = vld [vmem:[%s2949_s17 + $0x108] sm:$0xff] (%p2270_p3)  ;;  %v1423_v11 = vld [vmem:[%s2949_s17 + $0x110] sm:$0xff] (%p2270_p3) }
 0x185   : > { %1670 = vst [vmem:[%s2949_s17 + $0x208] sm:$0xff] %v1153_v38  ;;  %1406 = vst [vmem:[%s3084_s21 + $0xc8] sm:$0xff] (%p2270_p3), %v1405_v2  ;;  %v1425_v38 = vld [vmem:[%s2949_s17 + $0x118] sm:$0xff] (%p2270_p3)  ;;  %v1531_v14 = vld [vmem:[%s2949_s17 + $0x2c0] sm:$0xff] (%p2270_p3) }
 0x186   : > { %v655_v39 = vpop.f32.mrb[2].mxu0  ;;  %1408 = vst [vmem:[%s3084_s21 + $0xd0] sm:$0xff] (%p2270_p3), %v1407_v37  ;;  %1410 = vst [vmem:[%s3084_s21 + $0xd8] sm:$0xff] (%p2270_p3), %v1409_v3  ;;  %v1535_v37 = vld [vmem:[%s2949_s17 + $0x2d0] sm:$0xff] (%p2270_p3) }
 0x187   : > { %1233 = vst [vmem:[%s2949_s17 + $0x10] sm:$0xff] %v655_v39  ;;  %v1891_v42 = vpop.f32.mrb[66].mxu1  ;;  %v657_v12 = vpop.f32.mrb[3].mxu0  ;;  %1412 = vst [vmem:[%s3084_s21 + $0xe0] sm:$0xff] (%p2270_p3), %v1411_v26  ;;  %v1427_v39 = vld [vmem:[%s2949_s17 + $0x120] sm:$0xff] (%p2270_p3) }
 0x188   : > { %1673 = vst [vmem:[%s2949_s17 + $0x238] sm:$0xff] %v1891_v42  ;;  %1639 = vst [vmem:[%s2949_s17 + $0x190] sm:$0xff] %v657_v12  ;;  %v1163_v16 = vpop.f32.mrb[67].mxu1  ;;  %v1429_v42 = vld [vmem:[%s2949_s17 + $0x128] sm:$0xff] (%p2270_p3)  ;;  %v1431_v12 = vld [vmem:[%s2949_s17 + $0x130] sm:$0xff] (%p2270_p3) }
 0x189   : > { %1672 = vst [vmem:[%s2949_s17 + $0x228] sm:$0xff] %v1163_v16  ;;  %1414 = vst [vmem:[%s3084_s21 + $0xe8] sm:$0xff] (%p2270_p3), %v1413_v4  ;;  %v1433_v16 = vld [vmem:[%s2949_s17 + $0x138] sm:$0xff] (%p2270_p3)  ;;  %v1539_v26 = vld [vmem:[%s2949_s17 + $0x2e0] sm:$0xff] (%p2270_p3) }
 0x18a   : > { %v661_v17 = vpop.f32.mrb[4].mxu0  ;;  %v1355_v29 = vld [vmem:[%s2949_s17] sm:$0xff] (%p2270_p3)  ;;  %1416 = vst [vmem:[%s3084_s21 + $0xf0] sm:$0xff] (%p2270_p3), %v1415_v28  ;;  %1418 = vst [vmem:[%s3084_s21 + $0xf8] sm:$0xff] (%p2270_p3), %v1417_v9  ;;  %v1543_v28 = vld [vmem:[%s2949_s17 + $0x2f0] sm:$0xff] (%p2270_p3) }
 0x18b   : > { %1234 = vst [vmem:[%s2949_s17 + $0x20] sm:$0xff] %v661_v17  ;;  %v1894_v56 = vpop.f32.mrb[68].mxu1  ;;  %v663_v19 = vpop.f32.mrb[5].mxu0  ;;  %1356 = vst [vmem:[%s3084_s21] sm:$0xff] (%p2270_p3), %v1355_v29  ;;  %v1435_v17 = vld [vmem:[%s2949_s17 + $0x140] sm:$0xff] (%p2270_p3)  ;;  %v1489_v50 = vld [vmem:[%s2949_s17 + $0x218] sm:$0xff] (%p2270_p3) }
 0x18c   : > { %1675 = vst [vmem:[%s2949_s17 + $0x258] sm:$0xff] %v1894_v56  ;;  %1640 = vst [vmem:[%s2949_s17 + $0x1a0] sm:$0xff] %v663_v19  ;;  %v1173_v7 = vpop.f32.mrb[69].mxu1  ;;  %v1437_v56 = vld [vmem:[%s2949_s17 + $0x148] sm:$0xff] (%p2270_p3)  ;;  %v1439_v19 = vld [vmem:[%s2949_s17 + $0x150] sm:$0xff] (%p2270_p3) }
 0x18d   : > { %1674 = vst [vmem:[%s2949_s17 + $0x248] sm:$0xff] %v1173_v7  ;;  %1420 = vst [vmem:[%s3084_s21 + $0x100] sm:$0xff] (%p2270_p3), %v1419_v31  ;;  %v1441_v7 = vld [vmem:[%s2949_s17 + $0x158] sm:$0xff] (%p2270_p3)  ;;  %v1483_v29 = vld [vmem:[%s2949_s17 + $0x200] sm:$0xff] (%p2270_p3) }
 0x18e   : > { %v667_v44 = vpop.f32.mrb[6].mxu0  ;;  %v1359_v20 = vld [vmem:[%s2949_s17 + $0x10] sm:$0xff] (%p2270_p3)  ;;  %1422 = vst [vmem:[%s3084_s21 + $0x108] sm:$0xff] (%p2270_p3), %v1421_v10  ;;  %1424 = vst [vmem:[%s3084_s21 + $0x110] sm:$0xff] (%p2270_p3), %v1423_v11  ;;  %v1485_v35 = vld [vmem:[%s2949_s17 + $0x208] sm:$0xff] (%p2270_p3) }
 0x18f   : > { %1235 = vst [vmem:[%s2949_s17 + $0x30] sm:$0xff] %v667_v44  ;;  %v1897_v22 = vpop.f32.mrb[70].mxu1  ;;  %v669_v40 = vpop.f32.mrb[7].mxu0  ;;  %1360 = vst [vmem:[%s3084_s21 + $0x10] sm:$0xff] (%p2270_p3), %v1359_v20  ;;  %v1443_v44 = vld [vmem:[%s2949_s17 + $0x160] sm:$0xff] (%p2270_p3)  ;;  %v1487_v20 = vld [vmem:[%s2949_s17 + $0x210] sm:$0xff] (%p2270_p3) }
 0x190   : > { %1677 = vst [vmem:[%s2949_s17 + $0x278] sm:$0xff] %v1897_v22  ;;  %1641 = vst [vmem:[%s2949_s17 + $0x1b0] sm:$0xff] %v669_v40  ;;  %v1183_v52 = vpop.f32.mrb[71].mxu1  ;;  %v1445_v22 = vld [vmem:[%s2949_s17 + $0x168] sm:$0xff] (%p2270_p3)  ;;  %v1447_v40 = vld [vmem:[%s2949_s17 + $0x170] sm:$0xff] (%p2270_p3) }
 0x191   : > { %1676 = vst [vmem:[%s2949_s17 + $0x268] sm:$0xff] %v1183_v52  ;;  %1426 = vst [vmem:[%s3084_s21 + $0x118] sm:$0xff] (%p2270_p3), %v1425_v38  ;;  %v1449_v52 = vld [vmem:[%s2949_s17 + $0x178] sm:$0xff] (%p2270_p3)  ;;  %v1493_v32 = vld [vmem:[%s2949_s17 + $0x228] sm:$0xff] (%p2270_p3) }
 0x192   : > { %v673_v23 = vpop.f32.mrb[8].mxu0  ;;  %v1363_v51 = vld [vmem:[%s2949_s17 + $0x20] sm:$0xff] (%p2270_p3)  ;;  %1428 = vst [vmem:[%s3084_s21 + $0x120] sm:$0xff] (%p2270_p3), %v1427_v39  ;;  %1430 = vst [vmem:[%s3084_s21 + $0x128] sm:$0xff] (%p2270_p3), %v1429_v42  ;;  %v1497_v53 = vld [vmem:[%s2949_s17 + $0x238] sm:$0xff] (%p2270_p3) }
 0x193   : > { %1236 = vst [vmem:[%s2949_s17 + $0x40] sm:$0xff] %v673_v23  ;;  %v1900_v57 = vpop.f32.mrb[72].mxu1  ;;  %v675_v41 = vpop.f32.mrb[9].mxu0  ;;  %1364 = vst [vmem:[%s3084_s21 + $0x20] sm:$0xff] (%p2270_p3), %v1363_v51  ;;  %v1451_v23 = vld [vmem:[%s2949_s17 + $0x180] sm:$0xff] (%p2270_p3)  ;;  %v1505_v33 = vld [vmem:[%s2949_s17 + $0x258] sm:$0xff] (%p2270_p3) }
 0x194   : > { %1679 = vst [vmem:[%s2949_s17 + $0x298] sm:$0xff] %v1900_v57  ;;  %1642 = vst [vmem:[%s2949_s17 + $0x1c0] sm:$0xff] %v675_v41  ;;  %v1193_v6 = vpop.f32.mrb[73].mxu1  ;;  %v1453_v57 = vld [vmem:[%s2949_s17 + $0x188] sm:$0xff] (%p2270_p3)  ;;  %v1455_v41 = vld [vmem:[%s2949_s17 + $0x190] sm:$0xff] (%p2270_p3) }
 0x195   : > { %1678 = vst [vmem:[%s2949_s17 + $0x288] sm:$0xff] %v1193_v6  ;;  %1432 = vst [vmem:[%s3084_s21 + $0x130] sm:$0xff] (%p2270_p3), %v1431_v12  ;;  %v1457_v6 = vld [vmem:[%s2949_s17 + $0x198] sm:$0xff] (%p2270_p3)  ;;  %v1491_v51 = vld [vmem:[%s2949_s17 + $0x220] sm:$0xff] (%p2270_p3) }
 0x196   : > { %v679_v0 = vpop.f32.mrb[10].mxu0  ;;  %v1367_v43 = vld [vmem:[%s2949_s17 + $0x30] sm:$0xff] (%p2270_p3)  ;;  %1434 = vst [vmem:[%s3084_s21 + $0x138] sm:$0xff] (%p2270_p3), %v1433_v16  ;;  %1436 = vst [vmem:[%s3084_s21 + $0x140] sm:$0xff] (%p2270_p3), %v1435_v17  ;;  %v1501_v54 = vld [vmem:[%s2949_s17 + $0x248] sm:$0xff] (%p2270_p3) }
 0x197   : > { %1237 = vst [vmem:[%s2949_s17 + $0x50] sm:$0xff] %v679_v0  ;;  %v1903_v5 = vpop.f32.mrb[74].mxu1  ;;  %v681_v24 = vpop.f32.mrb[11].mxu0  ;;  %1368 = vst [vmem:[%s3084_s21 + $0x30] sm:$0xff] (%p2270_p3), %v1367_v43  ;;  %v1459_v0 = vld [vmem:[%s2949_s17 + $0x1a0] sm:$0xff] (%p2270_p3)  ;;  %v1495_v43 = vld [vmem:[%s2949_s17 + $0x230] sm:$0xff] (%p2270_p3) }
 0x198   : > { %1681 = vst [vmem:[%s2949_s17 + $0x2b8] sm:$0xff] %v1903_v5  ;;  %1643 = vst [vmem:[%s2949_s17 + $0x1d0] sm:$0xff] %v681_v24  ;;  %v1203_v15 = vpop.f32.mrb[75].mxu1  ;;  %v1461_v5 = vld [vmem:[%s2949_s17 + $0x1a8] sm:$0xff] (%p2270_p3)  ;;  %v1463_v24 = vld [vmem:[%s2949_s17 + $0x1b0] sm:$0xff] (%p2270_p3) }
 0x199   : > { %1680 = vst [vmem:[%s2949_s17 + $0x2a8] sm:$0xff] %v1203_v15  ;;  %1438 = vst [vmem:[%s3084_s21 + $0x148] sm:$0xff] (%p2270_p3), %v1437_v56  ;;  %v1465_v15 = vld [vmem:[%s2949_s17 + $0x1b8] sm:$0xff] (%p2270_p3)  ;;  %v1509_v58 = vld [vmem:[%s2949_s17 + $0x268] sm:$0xff] (%p2270_p3) }
 0x19a   : > { %v685_v21 = vpop.f32.mrb[12].mxu0  ;;  %v1371_v8 = vld [vmem:[%s2949_s17 + $0x40] sm:$0xff] (%p2270_p3)  ;;  %1440 = vst [vmem:[%s3084_s21 + $0x150] sm:$0xff] (%p2270_p3), %v1439_v19  ;;  %1442 = vst [vmem:[%s3084_s21 + $0x158] sm:$0xff] (%p2270_p3), %v1441_v7  ;;  %v1513_v59 = vld [vmem:[%s2949_s17 + $0x278] sm:$0xff] (%p2270_p3) }
 0x19b   : > { %1238 = vst [vmem:[%s2949_s17 + $0x60] sm:$0xff] %v685_v21  ;;  %v1906_v25 = vpop.f32.mrb[76].mxu1  ;;  %v687_v45 = vpop.f32.mrb[13].mxu0  ;;  %1335 = sbr.rel (!%p2270_p3) target bundleno = 443 (0x1bb), region = 36  ;;  %1372 = vst [vmem:[%s3084_s21 + $0x40] sm:$0xff] (%p2270_p3), %v1371_v8  ;;  %v1467_v21 = vld [vmem:[%s2949_s17 + $0x1c0] sm:$0xff] (%p2270_p3) }
 0x19c   : > { %1683 = vst [vmem:[%s2949_s17 + $0x2d8] sm:$0xff] %v1906_v25  ;;  %1644 = vst [vmem:[%s2949_s17 + $0x1e0] sm:$0xff] %v687_v45  ;;  %v1213_v46 = vpop.f32.mrb[77].mxu1  ;;  %v1469_v25 = vld [vmem:[%s2949_s17 + $0x1c8] sm:$0xff] (%p2270_p3)  ;;  %v1499_v8 = vld [vmem:[%s2949_s17 + $0x240] sm:$0xff] (%p2270_p3) }
 0x19d   : > { %1682 = vst [vmem:[%s2949_s17 + $0x2c8] sm:$0xff] %v1213_v46  ;;  %1444 = vst [vmem:[%s3084_s21 + $0x160] sm:$0xff] (%p2270_p3), %v1443_v44  ;;  %v1473_v46 = vld [vmem:[%s2949_s17 + $0x1d8] sm:$0xff] (%p2270_p3)  ;;  %v1517_v13 = vld [vmem:[%s2949_s17 + $0x288] sm:$0xff] (%p2270_p3) }
 0x19e   : > { %v691_v27 = vpop.f32.mrb[14].mxu0  ;;  %v1375_v48 = vld [vmem:[%s2949_s17 + $0x50] sm:$0xff] (%p2270_p3)  ;;  %1446 = vst [vmem:[%s3084_s21 + $0x168] sm:$0xff] (%p2270_p3), %v1445_v22  ;;  %1448 = vst [vmem:[%s3084_s21 + $0x170] sm:$0xff] (%p2270_p3), %v1447_v40  ;;  %v1521_v61 = vld [vmem:[%s2949_s17 + $0x298] sm:$0xff] (%p2270_p3) }
 0x19f   : > { %1239 = vst [vmem:[%s2949_s17 + $0x70] sm:$0xff] %v691_v27  ;;  %v1909_v47 = vpop.f32.mrb[78].mxu1  ;;  %v693_v49 = vpop.f32.mrb[15].mxu0  ;;  %1376 = vst [vmem:[%s3084_s21 + $0x50] sm:$0xff] (%p2270_p3), %v1375_v48  ;;  %v1471_v45 = vld [vmem:[%s2949_s17 + $0x1d0] sm:$0xff] (%p2270_p3)  ;;  %v1529_v36 = vld [vmem:[%s2949_s17 + $0x2b8] sm:$0xff] (%p2270_p3) }
 0x1a0   : > { %1685 = vst [vmem:[%s2949_s17 + $0x2f8] sm:$0xff] %v1909_v47  ;;  %1645 = vst [vmem:[%s2949_s17 + $0x1f0] sm:$0xff] %v693_v49  ;;  %v1223_v30 = vpop.f32.mrb[79].mxu1  ;;  %v1477_v47 = vld [vmem:[%s2949_s17 + $0x1e8] sm:$0xff] (%p2270_p3)  ;;  %v1503_v48 = vld [vmem:[%s2949_s17 + $0x250] sm:$0xff] (%p2270_p3) }
 0x1a1   : > { %1684 = vst [vmem:[%s2949_s17 + $0x2e8] sm:$0xff] %v1223_v30  ;;  %1450 = vst [vmem:[%s3084_s21 + $0x178] sm:$0xff] (%p2270_p3), %v1449_v52  ;;  %v1481_v30 = vld [vmem:[%s2949_s17 + $0x1f8] sm:$0xff] (%p2270_p3)  ;;  %v1525_v63 = vld [vmem:[%s2949_s17 + $0x2a8] sm:$0xff] (%p2270_p3) }
 0x1a2   : > { %v1379_v55 = vld [vmem:[%s2949_s17 + $0x60] sm:$0xff]  ;;  %1452 = vst [vmem:[%s3084_s21 + $0x300] sm:$0xff] %v1451_v23  ;;  %1454 = vst [vmem:[%s3084_s21 + $0x308] sm:$0xff] %v1453_v57 }
 0x1a3   : > { %1380 = vst [vmem:[%s3084_s21 + $0x60] sm:$0xff] %v1379_v55  ;;  %1456 = vst [vmem:[%s3084_s21 + $0x310] sm:$0xff] %v1455_v41  ;;  %v1475_v27 = vld [vmem:[%s2949_s17 + $0x1e0] sm:$0xff]  ;;  %v1537_v3 = vld [vmem:[%s2949_s17 + $0x2d8] sm:$0xff] }
 0x1a4   : > { %1458 = vst [vmem:[%s3084_s21 + $0x318] sm:$0xff] %v1457_v6  ;;  %1460 = vst [vmem:[%s3084_s21 + $0x320] sm:$0xff] %v1459_v0  ;;  %v1507_v55 = vld [vmem:[%s2949_s17 + $0x260] sm:$0xff]  ;;  %v1533_v2 = vld [vmem:[%s2949_s17 + $0x2c8] sm:$0xff] }
 0x1a5   : > { %1462 = vst [vmem:[%s3084_s21 + $0x328] sm:$0xff] %v1461_v5  ;;  %1464 = vst [vmem:[%s3084_s21 + $0x330] sm:$0xff] %v1463_v24 }
 0x1a6   : > { %v1383_v34 = vld [vmem:[%s2949_s17 + $0x70] sm:$0xff]  ;;  %1466 = vst [vmem:[%s3084_s21 + $0x338] sm:$0xff] %v1465_v15  ;;  %1468 = vst [vmem:[%s3084_s21 + $0x340] sm:$0xff] %v1467_v21 }
 0x1a7   : > { %1384 = vst [vmem:[%s3084_s21 + $0x70] sm:$0xff] %v1383_v34  ;;  %1470 = vst [vmem:[%s3084_s21 + $0x348] sm:$0xff] %v1469_v25  ;;  %v1479_v49 = vld [vmem:[%s2949_s17 + $0x1f0] sm:$0xff]  ;;  %v1545_v9 = vld [vmem:[%s2949_s17 + $0x2f8] sm:$0xff] }
 0x1a8   : > { %1472 = vst [vmem:[%s3084_s21 + $0x350] sm:$0xff] %v1471_v45  ;;  %1474 = vst [vmem:[%s3084_s21 + $0x358] sm:$0xff] %v1473_v46  ;;  %v1511_v34 = vld [vmem:[%s2949_s17 + $0x270] sm:$0xff]  ;;  %v1541_v4 = vld [vmem:[%s2949_s17 + $0x2e8] sm:$0xff] }
 0x1a9   : > { %1476 = vst [vmem:[%s3084_s21 + $0x360] sm:$0xff] %v1475_v27  ;;  %1478 = vst [vmem:[%s3084_s21 + $0x368] sm:$0xff] %v1477_v47 }
 0x1aa   : > { %1480 = vst [vmem:[%s3084_s21 + $0x370] sm:$0xff] %v1479_v49  ;;  %1482 = vst [vmem:[%s3084_s21 + $0x378] sm:$0xff] %v1481_v30 }
 0x1ab   : > { %1484 = vst [vmem:[%s3084_s21 + $0x380] sm:$0xff] %v1483_v29  ;;  %1486 = vst [vmem:[%s3084_s21 + $0x388] sm:$0xff] %v1485_v35 }
 0x1ac   : > { %1488 = vst [vmem:[%s3084_s21 + $0x390] sm:$0xff] %v1487_v20  ;;  %1490 = vst [vmem:[%s3084_s21 + $0x398] sm:$0xff] %v1489_v50 }
 0x1ad   : > { %1492 = vst [vmem:[%s3084_s21 + $0x3a0] sm:$0xff] %v1491_v51  ;;  %1494 = vst [vmem:[%s3084_s21 + $0x3a8] sm:$0xff] %v1493_v32 }
 0x1ae   : > { %1496 = vst [vmem:[%s3084_s21 + $0x3b0] sm:$0xff] %v1495_v43  ;;  %1498 = vst [vmem:[%s3084_s21 + $0x3b8] sm:$0xff] %v1497_v53 }
 0x1af   : > { %1500 = vst [vmem:[%s3084_s21 + $0x3c0] sm:$0xff] %v1499_v8  ;;  %1502 = vst [vmem:[%s3084_s21 + $0x3c8] sm:$0xff] %v1501_v54 }
 0x1b0   : > { %1504 = vst [vmem:[%s3084_s21 + $0x3d0] sm:$0xff] %v1503_v48  ;;  %1506 = vst [vmem:[%s3084_s21 + $0x3d8] sm:$0xff] %v1505_v33 }
 0x1b1   : > { %1508 = vst [vmem:[%s3084_s21 + $0x3e0] sm:$0xff] %v1507_v55  ;;  %1510 = vst [vmem:[%s3084_s21 + $0x3e8] sm:$0xff] %v1509_v58 }
 0x1b2   : > { %1512 = vst [vmem:[%s3084_s21 + $0x3f0] sm:$0xff] %v1511_v34  ;;  %1514 = vst [vmem:[%s3084_s21 + $0x3f8] sm:$0xff] %v1513_v59 }
 0x1b3   : > { %1516 = vst [vmem:[%s3084_s21 + $0x400] sm:$0xff] %v1515_v62  ;;  %1518 = vst [vmem:[%s3084_s21 + $0x408] sm:$0xff] %v1517_v13 }
 0x1b4   : > { %1520 = vst [vmem:[%s3084_s21 + $0x410] sm:$0xff] %v1519_v60  ;;  %1522 = vst [vmem:[%s3084_s21 + $0x418] sm:$0xff] %v1521_v61 }
 0x1b5   : > { %1524 = vst [vmem:[%s3084_s21 + $0x420] sm:$0xff] %v1523_v18  ;;  %1526 = vst [vmem:[%s3084_s21 + $0x428] sm:$0xff] %v1525_v63 }
 0x1b6   : > { %1528 = vst [vmem:[%s3084_s21 + $0x430] sm:$0xff] %v1527_v1  ;;  %1530 = vst [vmem:[%s3084_s21 + $0x438] sm:$0xff] %v1529_v36 }
 0x1b7   : > { %1532 = vst [vmem:[%s3084_s21 + $0x440] sm:$0xff] %v1531_v14  ;;  %1534 = vst [vmem:[%s3084_s21 + $0x448] sm:$0xff] %v1533_v2 }
 0x1b8   : > { %1536 = vst [vmem:[%s3084_s21 + $0x450] sm:$0xff] %v1535_v37  ;;  %1538 = vst [vmem:[%s3084_s21 + $0x458] sm:$0xff] %v1537_v3 }
 0x1b9   : > { %1540 = vst [vmem:[%s3084_s21 + $0x460] sm:$0xff] %v1539_v26  ;;  %1542 = vst [vmem:[%s3084_s21 + $0x468] sm:$0xff] %v1541_v4 }
 0x1ba   : > { %1544 = vst [vmem:[%s3084_s21 + $0x470] sm:$0xff] %v1543_v28  ;;  %1546 = vst [vmem:[%s3084_s21 + $0x478] sm:$0xff] %v1545_v9 }
 0x1bb PF: > { %s13_s16 = sadd.s32 1, %s2215_s16   ;;  %s3293_s12 = smov %s2203_s13 }
 0x1bc   : > { %p10_p9 = scmp.ge.s32.totalorder %s13_s16, 4   ;;  %s3294_s13 = smov %s2279_s22 }
 0x1bd   : > { %s3295_s14 = smov %s2211_s15  ;;  %s3296_s15 = smov %s3298_s18 }
 0x1be   :  { %12 = sbr.rel (!%p10_p9) target bundleno = 3 (0x3), region = 90 }

</bundles_post_ra>
